<compile_context>
chip_gen: v7x
topology: tpu7x:2x2x1
jax: 0.10.0
libtpu: 0.0.40
codegen_flags: <defaults>
</compile_context>

<pallas_src>
import functools
import math

import jax
import jax.numpy as jnp
from jax.experimental import pallas as pl
from jax.experimental.pallas import tpu as pltpu

_LANE = 128


# ---------------------------------------------------------------------------
# Fused kernel: DFT + all coupling steps + final log-prob / log-jacobian
# ---------------------------------------------------------------------------
def _fused_flow_kernel(x_ref, F_ref, *refs, k, d, hidden, n_flows, flips, fft,
                       fuse_l2, n_w, mm_dtype, approx_sigmoid):
    w = refs[:n_w]
    z_ref = refs[n_w]
    stats_ref = refs[n_w + 1]
    h = hidden

    def act(v):
        if approx_sigmoid:
            # EUP exp + approximate EUP reciprocal: keeps the VPU divide off the
            # critical path (MXU is underfilled here, transcendentals dominate).
            return pl.reciprocal(1.0 + jnp.exp(-v), approx=True)
        return jax.nn.sigmoid(v)

    # Stage 0: DFT as one (d,d) @ (d,TB) matmul; batch rides the lane axis.
    xT = x_ref[...]                                           # (d, TB) f32
    if fft:
        xT = jnp.dot(F_ref[...], xT.astype(mm_dtype),
                     preferred_element_type=jnp.float32)      # (d, TB) f32

    # Loop-carried halves (plain values; never round-tripped through z_ref).
    low, high = xT[:k, :], xT[k:, :]

    tb = x_ref.shape[1]
    logjac = jnp.zeros((1, tb), jnp.float32)

    if fuse_l2:
        W1, B1, W2, B2, W3s, B3s, W3m, B3m = w
    else:
        W1, B1, W2s, B2s, W2m, B2m, W3s, B3s, W3m, B3m = w

    # n_flows is small (3): static unroll.
    # TODO(synk): switch to lax.fori_loop with dynamic weight indexing if n_flows grows >~8.
    for i in range(n_flows):
        x1, x2 = (high, low) if flips[i] else (low, high)

        # Layer 1: sig/mu nets concatenated -> one matmul, (2h, TB).
        h1 = act(jnp.dot(W1[i], x1.astype(mm_dtype),
                         preferred_element_type=jnp.float32) + B1[i])

        if fuse_l2:
            # Layer 2: block-diagonal fusion (kept only while 2h <= 128).
            h2 = act(jnp.dot(W2[i], h1.astype(mm_dtype),
                             preferred_element_type=jnp.float32) + B2[i])
            h2s, h2m = h2[:h, :], h2[h:, :]
        else:
            h2s = act(jnp.dot(W2s[i], h1[:h, :].astype(mm_dtype),
                              preferred_element_type=jnp.float32) + B2s[i])
            h2m = act(jnp.dot(W2m[i], h1[h:, :].astype(mm_dtype),
                              preferred_element_type=jnp.float32) + B2m[i])

        # Layer 3: separate sig / mu heads -> (k, TB) each, no unaligned splits.
        sig = jnp.dot(W3s[i], h2s.astype(mm_dtype),
                      preferred_element_type=jnp.float32) + B3s[i]
        mu = jnp.dot(W3m[i], h2m.astype(mm_dtype),
                     preferred_element_type=jnp.float32) + B3m[i]

        # Elementwise / transcendental math kept in f32 (v5e has no bf16 VPU/EUP).
        z2 = x2 * jnp.exp(sig) + mu
        logjac = logjac + jnp.sum(sig, axis=0, keepdims=True)

        if flips[i]:
            low = z2          # x1 == high stays in place
        else:
            high = z2         # x1 == low stays in place

    # One dense write of the z tile and one merged (2, TB) stats write per grid step.
    z_ref[:k, :] = low
    z_ref[k:, :] = high
    sq = (jnp.sum(low * low, axis=0, keepdims=True)
          + jnp.sum(high * high, axis=0, keepdims=True))
    logpz = -0.5 * sq - 0.5 * d * math.log(2.0 * math.pi)
    stats_ref[...] = jnp.concatenate([logpz, logjac], axis=0)


# ---------------------------------------------------------------------------
# Tiling / VMEM planning
# ---------------------------------------------------------------------------
def _max_lane_tile(d, hidden, k, budget_bytes=24 * 2**20):
    """Largest 128-multiple lane tile whose rough f32 working set fits the budget
    (24 MiB keeps the kernel inside v7x's 32 MiB scoped-VMEM default)."""
    per_lane = 4 * (4 * d + 8 * hidden + 6 * k + 16)   # io (double-buffered) + live values
    tb = (budget_bytes // max(per_lane, 1)) // _LANE * _LANE
    return int(max(_LANE, min(tb, 8192)))


def _plan_batch(B, max_tb):
    """Return (padded_B, lane_tile): lane axis 128-dense when possible, grid >= 2
    when the batch allows (so 'parallel' can split across v7x's two TensorCores)."""
    if B <= _LANE:
        return B, B                                    # single small block, full-dim lanes
    Bp = -(-B // _LANE) * _LANE                        # pad batch to a multiple of 128
    cands = [m * _LANE for m in range(1, min(Bp, max_tb) // _LANE + 1)
             if Bp % (m * _LANE) == 0]
    two_step = [t for t in cands if Bp // t >= 2]
    tb = max(two_step) if two_step else max(cands)
    return Bp, tb


def _vmem_limit_bytes(tb, d, k, hidden, n_flows, fuse_l2, mm_bytes):
    io = 2 * 4 * tb * (d + d + 2)                      # x in + z out + stats out, double-buffered
    h2 = 2 * hidden
    w_elems = d * d
    if fuse_l2:
        w_elems += n_flows * (h2 * k + h2 * h2 + 2 * k * hidden)
    else:
        w_elems += n_flows * (h2 * k + 2 * hidden * hidden + 2 * k * hidden)
    b_elems = n_flows * (h2 + h2 + 2 * k)
    weights = 2 * (w_elems * mm_bytes + b_elems * 4)
    live = 4 * tb * (2 * d + 3 * h2 + 4 * k + 8)       # rough live-intermediate bound
    est = io + weights + live
    return int(min(64 * 2**20, max(32 * 2**20, 2 * est)))   # cap: v7x physical is 64 MiB


# ---------------------------------------------------------------------------
# pallas_call wrapper
# ---------------------------------------------------------------------------
@functools.partial(jax.jit,
                   static_argnames=("k", "d", "hidden", "flips", "fft",
                                    "fuse_l2", "approx_sigmoid"))
def fourier_flow_forward(x, Ft, weights, *, k, d, hidden, flips, fft, fuse_l2,
                         approx_sigmoid):
    B = x.shape[0]
    n_flows = len(flips)
    n_w = len(weights)
    mm_dtype = weights[0].dtype
    mm_bytes = jnp.dtype(mm_dtype).itemsize

    max_tb = _max_lane_tile(d, hidden, k)
    Bp, tb = _plan_batch(B, max_tb)
    grid = (Bp // tb,)

    # Layout plumbing in the wrapper: batch -> lane axis, pad to a lane-dense width.
    xT = jnp.transpose(x.astype(jnp.float32))          # (d, B)
    if Bp != B:
        xT = jnp.pad(xT, ((0, 0), (0, Bp - B)))

    kernel = functools.partial(
        _fused_flow_kernel, k=k, d=d, hidden=hidden, n_flows=n_flows,
        flips=flips, fft=fft, fuse_l2=fuse_l2, n_w=n_w, mm_dtype=mm_dtype,
        approx_sigmoid=approx_sigmoid)

    def resident(shape):
        zeros = (0,) * len(shape)
        return pl.BlockSpec(shape, lambda i, z=zeros: z)

    in_specs = ([pl.BlockSpec((d, tb), lambda i: (0, i)),   # x^T: batch-tiled on lanes
                 resident(Ft.shape)]                         # DFT matrix, resident
                + [resident(w.shape) for w in weights])      # weight stacks, resident
    out_specs = (pl.BlockSpec((d, tb), lambda i: (0, i)),    # z^T
                 pl.BlockSpec((2, tb), lambda i: (0, i)))    # [log_pz ; log_jac]
    out_shape = (jax.ShapeDtypeStruct((d, Bp), jnp.float32),
                 jax.ShapeDtypeStruct((2, Bp), jnp.float32))

    zT, stats = pl.pallas_call(
        kernel,
        out_shape=out_shape,
        grid=grid,
        in_specs=in_specs,
        out_specs=out_specs,
        compiler_params=pltpu.CompilerParams(
            dimension_semantics=("parallel",),
            vmem_limit_bytes=_vmem_limit_bytes(tb, d, k, hidden, n_flows,
                                               fuse_l2, mm_bytes)),
    )(xT, Ft, *weights)

    z = jnp.transpose(zT[:, :B])
    return z, stats[0, :B], stats[1, :B]


# ---------------------------------------------------------------------------
# Parameter setup (glue) + wrapper class
# ---------------------------------------------------------------------------
def _init_linear(key, fan_in, fan_out):
    """PyTorch nn.Linear-style uniform init, W stored as (in, out) for x @ W."""
    kw, kb = jax.random.split(key)
    bound = 1.0 / math.sqrt(fan_in)
    w = jax.random.uniform(kw, (fan_in, fan_out), jnp.float32, -bound, bound)
    b = jax.random.uniform(kb, (1, fan_out), jnp.float32, -bound, bound)
    return w, b


def _block_diag(a, b):
    m, n = a.shape
    p, q = b.shape
    top = jnp.concatenate([a, jnp.zeros((m, q), a.dtype)], axis=1)
    bot = jnp.concatenate([jnp.zeros((p, n), b.dtype), b], axis=1)
    return jnp.concatenate([top, bot], axis=0)


class FourierFlowPallas:
    def __init__(self, hidden, n_flows, d, FFT=True, flip=True, normalize=False,
                 key=None, matmul_dtype=jnp.float32, approx_sigmoid=False):
        assert d % 2 == 0
        self.FFT = FFT
        self.normalize = normalize  # TODO(synk): normalize=True needs fft_mean/fft_std from fit() (training-time state); not reproduced.
        self.hidden = hidden
        self.n_flows = n_flows
        self.d = d
        self.k = d // 2
        self.flips = tuple(bool(i % 2) if flip else False for i in range(n_flows))
        self.matmul_dtype = matmul_dtype            # bf16 recommended on v6e/v7x
        self.approx_sigmoid = approx_sigmoid
        # Keep the block-diagonal layer-2 fusion only while 2h fits one MXU K tile
        # on every generation (128 on v5e); beyond that the zero block wastes FLOPs.
        self.fuse_l2 = (2 * hidden) <= 128

        if key is None:
            key = jax.random.PRNGKey(0)

        # Raw per-bijector params in f32 (also used by the pure-JAX reference).
        self.bijector_params = []
        for _ in range(n_flows):
            params = []
            for _net in range(2):                    # sig_net, mu_net
                key, k1, k2, k3 = jax.random.split(key, 4)
                w1, b1 = _init_linear(k1, self.k, hidden)
                w2, b2 = _init_linear(k2, hidden, hidden)
                w3, b3 = _init_linear(k3, hidden, self.k)
                params += [w1, b1, w2, b2, w3, b3]
            self.bijector_params.append(tuple(params))

        # Transposed / fused weight stacks for the lane-major kernel layout.
        md = matmul_dtype
        W1, B1 = [], []
        W2d, B2d, W2s_, B2s_, W2m_, B2m_ = [], [], [], [], [], []
        W3s, B3s, W3m, B3m = [], [], [], []
        for (w1s, b1s, w2s, b2s, w3s, b3s,
             w1m, b1m, w2m, b2m, w3m, b3m) in self.bijector_params:
            W1.append(jnp.concatenate([w1s, w1m], axis=1).T)         # (2h, k)
            B1.append(jnp.concatenate([b1s, b1m], axis=1).T)         # (2h, 1)
            if self.fuse_l2:
                W2d.append(_block_diag(w2s, w2m).T)                  # (2h, 2h)
                B2d.append(jnp.concatenate([b2s, b2m], axis=1).T)    # (2h, 1)
            else:
                W2s_.append(w2s.T); B2s_.append(b2s.T)
                W2m_.append(w2m.T); B2m_.append(b2m.T)
            W3s.append(w3s.T); B3s.append(b3s.T)                     # (k, h), (k, 1)
            W3m.append(w3m.T); B3m.append(b3m.T)

        def stack(xs, dtype):
            return jnp.stack(xs).astype(dtype)

        if self.fuse_l2:
            self.weights = (stack(W1, md), stack(B1, jnp.float32),
                            stack(W2d, md), stack(B2d, jnp.float32),
                            stack(W3s, md), stack(B3s, jnp.float32),
                            stack(W3m, md), stack(B3m, jnp.float32))
        else:
            self.weights = (stack(W1, md), stack(B1, jnp.float32),
                            stack(W2s_, md), stack(B2s_, jnp.float32),
                            stack(W2m_, md), stack(B2m_, jnp.float32),
                            stack(W3s, md), stack(B3s, jnp.float32),
                            stack(W3m, md), stack(B3m, jnp.float32))

        # DFT matrix, built once.  Non-transposed: x @ F = [Re_0..Re_{k-1} | Im_0..Im_{k-1}];
        # the kernel computes F^T @ x^T so we store the transpose.
        n = jnp.arange(d, dtype=jnp.float32)[:, None]
        f = jnp.arange(self.k, dtype=jnp.float32)[None, :]
        ang = 2.0 * math.pi * n * f / d
        F = jnp.concatenate([jnp.cos(ang), -jnp.sin(ang)], axis=1)   # (d, d)
        self.Ft = F.T.astype(md)

    def __call__(self, x):
        # x: (B, d) float32 (already flattened to rows, as in fit()).
        return fourier_flow_forward(
            x, self.Ft, self.weights,
            k=self.k, d=self.d, hidden=self.hidden, flips=self.flips,
            fft=self.FFT, fuse_l2=self.fuse_l2,
            approx_sigmoid=self.approx_sigmoid)


# ---------------------------------------------------------------------------
# Pure-JAX reference (same math, no Pallas) for a sanity check
# ---------------------------------------------------------------------------
def _reference_forward(x, flow):
    k, d = flow.k, flow.d
    if flow.FFT:
        Xf = jnp.fft.fft(x.astype(jnp.complex64), axis=-1)
        x = jnp.concatenate(
            [jnp.real(Xf)[:, :k], jnp.imag(Xf)[:, :k]], axis=-1
        ).astype(jnp.float32)
    log_jacobs = []
    log_pz = None
    for params, f in zip(flow.bijector_params, flow.flips):
        (w1s, b1s, w2s, b2s, w3s, b3s,
         w1m, b1m, w2m, b2m, w3m, b3m) = params
        if f:
            x1, x2 = x[:, k:], x[:, :k]
        else:
            x1, x2 = x[:, :k], x[:, k:]

        def mlp(h, w1, b1, w2, b2, w3, b3):
            h = jax.nn.sigmoid(h @ w1 + b1)
            h = jax.nn.sigmoid(h @ w2 + b2)
            return h @ w3 + b3

        sig = mlp(x1, w1s, b1s, w2s, b2s, w3s, b3s)
        mu = mlp(x1, w1m, b1m, w2m, b2m, w3m, b3m)
        z2 = x2 * jnp.exp(sig) + mu
        x = jnp.concatenate([z2, x1], -1) if f else jnp.concatenate([x1, z2], -1)
        log_pz = -0.5 * jnp.sum(x * x, -1) - 0.5 * d * math.log(2.0 * math.pi)
        log_jacobs.append(jnp.sum(sig, -1))
    return x, log_pz, sum(log_jacobs)


# ---------------------------------------------------------------------------
if __name__ == "__main__":
    key = jax.random.PRNGKey(0)
    k_data, k_model = jax.random.split(key)

    # individual_shape = (T=8, C=2) -> d = 16 (even), k = 8; hidden = 32; n_flows = 3.
    # Batch 256 so the lane axis is 128-dense and the grid has 2 steps (v7x 2-TC split).
    B, T, C = 256, 8, 2
    d = T * C
    hidden, n_flows = 32, 3

    x = jax.random.normal(k_data, (B, T, C), dtype=jnp.float32)
    x_flat = x.reshape(B, d)                              # fit() reshapes to (-1, d)

    # Exact path: f32 MXU operands, exact sigmoid.
    flow = FourierFlowPallas(hidden=hidden, n_flows=n_flows, d=d,
                             FFT=True, flip=True, normalize=False, key=k_model)
    z, log_pz, log_jacob = flow(x_flat)
    jax.block_until_ready((z, log_pz, log_jacob))

    z_ref, log_pz_ref, log_jacob_ref = _reference_forward(x_flat, flow)
    assert z.shape == (B, d) and log_pz.shape == (B,) and log_jacob.shape == (B,)
    assert jnp.allclose(z, z_ref, rtol=1e-2, atol=1e-2)
    assert jnp.allclose(log_pz, log_pz_ref, rtol=1e-2, atol=1e-2)
    assert jnp.allclose(log_jacob, log_jacob_ref, rtol=1e-2, atol=1e-2)

    # Throughput path (v6e/v7x recommendation): bf16 MXU operands + approx-reciprocal
    # sigmoid; elementwise / exp / log stats stay f32.  Checked against the tensor scale.
    flow_fast = FourierFlowPallas(hidden=hidden, n_flows=n_flows, d=d,
                                  FFT=True, flip=True, normalize=False,
                                  key=k_model, matmul_dtype=jnp.bfloat16,
                                  approx_sigmoid=True)
    z_f, log_pz_f, log_jacob_f = flow_fast(x_flat)
    jax.block_until_ready((z_f, log_pz_f, log_jacob_f))

    def close_to_scale(a, b, frac=0.05):
        scale = jnp.max(jnp.abs(b))
        return bool(jnp.max(jnp.abs(a - b)) <= frac * scale + 0.05)

    assert close_to_scale(z_f, z_ref)
    assert close_to_scale(log_pz_f, log_pz_ref)
    assert close_to_scale(log_jacob_f, log_jacob_ref)

    print("KERNEL_OK")
</pallas_src>

<mosaic_0001>
module attributes {stable_mosaic.version = 11 : i64} {
  func.func @_fused_flow_kernel(%arg0: i32, %arg1: memref<16x128xf32, #tpu.memory_space<vmem>>, %arg2: memref<16x16xf32, #tpu.memory_space<vmem>>, %arg3: memref<3x64x8xf32, #tpu.memory_space<vmem>>, %arg4: memref<3x64x1xf32, #tpu.memory_space<vmem>>, %arg5: memref<3x64x64xf32, #tpu.memory_space<vmem>>, %arg6: memref<3x64x1xf32, #tpu.memory_space<vmem>>, %arg7: memref<3x8x32xf32, #tpu.memory_space<vmem>>, %arg8: memref<3x8x1xf32, #tpu.memory_space<vmem>>, %arg9: memref<3x8x32xf32, #tpu.memory_space<vmem>>, %arg10: memref<3x8x1xf32, #tpu.memory_space<vmem>>, %arg11: memref<16x128xf32, #tpu.memory_space<vmem>>, %arg12: memref<2x128xf32, #tpu.memory_space<vmem>>) attributes {dimension_semantics = [#tpu.dimension_semantics<parallel>], iteration_bounds = array<i64: 2>, scalar_prefetch = 0 : i64, scratch_operands = 0 : i64, tpu.core_type = #tpu.core_type<tc>, window_params = [{transform_indices = @transform_0, window_bounds = array<i64: 16, 128>}, {pipeline_mode = #tpu.pipeline_mode<synchronous>, transform_indices = @transform_1, window_bounds = array<i64: 16, 16>}, {pipeline_mode = #tpu.pipeline_mode<synchronous>, transform_indices = @transform_2, window_bounds = array<i64: 3, 64, 8>}, {pipeline_mode = #tpu.pipeline_mode<synchronous>, transform_indices = @transform_3, window_bounds = array<i64: 3, 64, 1>}, {pipeline_mode = #tpu.pipeline_mode<synchronous>, transform_indices = @transform_4, window_bounds = array<i64: 3, 64, 64>}, {pipeline_mode = #tpu.pipeline_mode<synchronous>, transform_indices = @transform_5, window_bounds = array<i64: 3, 64, 1>}, {pipeline_mode = #tpu.pipeline_mode<synchronous>, transform_indices = @transform_6, window_bounds = array<i64: 3, 8, 32>}, {pipeline_mode = #tpu.pipeline_mode<synchronous>, transform_indices = @transform_7, window_bounds = array<i64: 3, 8, 1>}, {pipeline_mode = #tpu.pipeline_mode<synchronous>, transform_indices = @transform_8, window_bounds = array<i64: 3, 8, 32>}, {pipeline_mode = #tpu.pipeline_mode<synchronous>, transform_indices = @transform_9, window_bounds = array<i64: 3, 8, 1>}, {transform_indices = @transform_10, window_bounds = array<i64: 16, 128>}, {transform_indices = @transform_11, window_bounds = array<i64: 2, 128>}]} {
    %c0 = arith.constant 0 : index
    %c0_0 = arith.constant 0 : index
    %0 = vector.load %arg1[%c0, %c0_0] : memref<16x128xf32, #tpu.memory_space<vmem>>, vector<16x128xf32>
    %c0_1 = arith.constant 0 : index
    %c0_2 = arith.constant 0 : index
    %1 = vector.load %arg2[%c0_1, %c0_2] : memref<16x16xf32, #tpu.memory_space<vmem>>, vector<16x16xf32>
    %cst = arith.constant dense<0.000000e+00> : vector<16x128xf32>
    %2 = tpu.matmul %1, %0, %cst {dimension_numbers = #tpu.dot_dimension_numbers<[1], [0], [0], [1], [0, 0, 1, 1], [], []>} : vector<16x16xf32>, vector<16x128xf32>, vector<16x128xf32> -> vector<16x128xf32>
    %3 = vector.extract_strided_slice %2 {offsets = [0, 0], sizes = [8, 128], strides = [1, 1]} : vector<16x128xf32> to vector<8x128xf32>
    %4 = vector.extract_strided_slice %2 {offsets = [8, 0], sizes = [8, 128], strides = [1, 1]} : vector<16x128xf32> to vector<8x128xf32>
    %cst_3 = arith.constant 0.000000e+00 : f32
    %5 = vector.broadcast %cst_3 : f32 to vector<1x128xf32>
    %c0_4 = arith.constant 0 : index
    %c0_5 = arith.constant 0 : index
    %c0_6 = arith.constant 0 : index
    %6 = vector.load %arg3[%c0_4, %c0_5, %c0_6] : memref<3x64x8xf32, #tpu.memory_space<vmem>>, vector<1x64x8xf32>
    %7 = vector.shape_cast %6 : vector<1x64x8xf32> to vector<64x8xf32>
    %cst_7 = arith.constant dense<0.000000e+00> : vector<64x128xf32>
    %8 = tpu.matmul %7, %3, %cst_7 {dimension_numbers = #tpu.dot_dimension_numbers<[1], [0], [0], [1], [0, 0, 1, 1], [], []>} : vector<64x8xf32>, vector<8x128xf32>, vector<64x128xf32> -> vector<64x128xf32>
    %c0_8 = arith.constant 0 : index
    %c0_9 = arith.constant 0 : index
    %c0_10 = arith.constant 0 : index
    %9 = vector.load %arg4[%c0_8, %c0_9, %c0_10] : memref<3x64x1xf32, #tpu.memory_space<vmem>>, vector<1x64x1xf32>
    %10 = vector.shape_cast %9 : vector<1x64x1xf32> to vector<64x1xf32>
    %11 = vector.broadcast %10 : vector<64x1xf32> to vector<64x128xf32>
    %12 = arith.addf %8, %11 : vector<64x128xf32>
    %13 = arith.negf %12 : vector<64x128xf32>
    %14 = math.exp %13 : vector<64x128xf32>
    %cst_11 = arith.constant 1.000000e+00 : f32
    %15 = vector.broadcast %cst_11 : f32 to vector<64x128xf32>
    %16 = arith.addf %15, %14 : vector<64x128xf32>
    %17 = arith.divf %15, %16 : vector<64x128xf32>
    %c0_12 = arith.constant 0 : index
    %c0_13 = arith.constant 0 : index
    %c0_14 = arith.constant 0 : index
    %18 = vector.load %arg5[%c0_12, %c0_13, %c0_14] : memref<3x64x64xf32, #tpu.memory_space<vmem>>, vector<1x64x64xf32>
    %19 = vector.shape_cast %18 : vector<1x64x64xf32> to vector<64x64xf32>
    %cst_15 = arith.constant dense<0.000000e+00> : vector<64x128xf32>
    %20 = tpu.matmul %19, %17, %cst_15 {dimension_numbers = #tpu.dot_dimension_numbers<[1], [0], [0], [1], [0, 0, 1, 1], [], []>} : vector<64x64xf32>, vector<64x128xf32>, vector<64x128xf32> -> vector<64x128xf32>
    %c0_16 = arith.constant 0 : index
    %c0_17 = arith.constant 0 : index
    %c0_18 = arith.constant 0 : index
    %21 = vector.load %arg6[%c0_16, %c0_17, %c0_18] : memref<3x64x1xf32, #tpu.memory_space<vmem>>, vector<1x64x1xf32>
    %22 = vector.shape_cast %21 : vector<1x64x1xf32> to vector<64x1xf32>
    %23 = vector.broadcast %22 : vector<64x1xf32> to vector<64x128xf32>
    %24 = arith.addf %20, %23 : vector<64x128xf32>
    %25 = arith.negf %24 : vector<64x128xf32>
    %26 = math.exp %25 : vector<64x128xf32>
    %cst_19 = arith.constant 1.000000e+00 : f32
    %27 = vector.broadcast %cst_19 : f32 to vector<64x128xf32>
    %28 = arith.addf %27, %26 : vector<64x128xf32>
    %29 = arith.divf %27, %28 : vector<64x128xf32>
    %30 = vector.extract_strided_slice %29 {offsets = [0, 0], sizes = [32, 128], strides = [1, 1]} : vector<64x128xf32> to vector<32x128xf32>
    %31 = vector.extract_strided_slice %29 {offsets = [32, 0], sizes = [32, 128], strides = [1, 1]} : vector<64x128xf32> to vector<32x128xf32>
    %c0_20 = arith.constant 0 : index
    %c0_21 = arith.constant 0 : index
    %c0_22 = arith.constant 0 : index
    %32 = vector.load %arg7[%c0_20, %c0_21, %c0_22] : memref<3x8x32xf32, #tpu.memory_space<vmem>>, vector<1x8x32xf32>
    %33 = vector.shape_cast %32 : vector<1x8x32xf32> to vector<8x32xf32>
    %cst_23 = arith.constant dense<0.000000e+00> : vector<8x128xf32>
    %34 = tpu.matmul %33, %30, %cst_23 {dimension_numbers = #tpu.dot_dimension_numbers<[1], [0], [0], [1], [0, 0, 1, 1], [], []>} : vector<8x32xf32>, vector<32x128xf32>, vector<8x128xf32> -> vector<8x128xf32>
    %c0_24 = arith.constant 0 : index
    %c0_25 = arith.constant 0 : index
    %c0_26 = arith.constant 0 : index
    %35 = vector.load %arg8[%c0_24, %c0_25, %c0_26] : memref<3x8x1xf32, #tpu.memory_space<vmem>>, vector<1x8x1xf32>
    %36 = vector.shape_cast %35 : vector<1x8x1xf32> to vector<8x1xf32>
    %37 = vector.broadcast %36 : vector<8x1xf32> to vector<8x128xf32>
    %38 = arith.addf %34, %37 : vector<8x128xf32>
    %c0_27 = arith.constant 0 : index
    %c0_28 = arith.constant 0 : index
    %c0_29 = arith.constant 0 : index
    %39 = vector.load %arg9[%c0_27, %c0_28, %c0_29] : memref<3x8x32xf32, #tpu.memory_space<vmem>>, vector<1x8x32xf32>
    %40 = vector.shape_cast %39 : vector<1x8x32xf32> to vector<8x32xf32>
    %cst_30 = arith.constant dense<0.000000e+00> : vector<8x128xf32>
    %41 = tpu.matmul %40, %31, %cst_30 {dimension_numbers = #tpu.dot_dimension_numbers<[1], [0], [0], [1], [0, 0, 1, 1], [], []>} : vector<8x32xf32>, vector<32x128xf32>, vector<8x128xf32> -> vector<8x128xf32>
    %c0_31 = arith.constant 0 : index
    %c0_32 = arith.constant 0 : index
    %c0_33 = arith.constant 0 : index
    %42 = vector.load %arg10[%c0_31, %c0_32, %c0_33] : memref<3x8x1xf32, #tpu.memory_space<vmem>>, vector<1x8x1xf32>
    %43 = vector.shape_cast %42 : vector<1x8x1xf32> to vector<8x1xf32>
    %44 = vector.broadcast %43 : vector<8x1xf32> to vector<8x128xf32>
    %45 = arith.addf %41, %44 : vector<8x128xf32>
    %46 = math.exp %38 : vector<8x128xf32>
    %47 = arith.mulf %4, %46 : vector<8x128xf32>
    %48 = arith.addf %47, %45 : vector<8x128xf32>
    %cst_34 = arith.constant dense<0.000000e+00> : vector<128xf32>
    %49 = vector.multi_reduction <add>, %38, %cst_34 [0] : vector<8x128xf32> to vector<128xf32>
    %50 = vector.shape_cast %49 : vector<128xf32> to vector<1x128xf32>
    %51 = arith.addf %5, %50 : vector<1x128xf32>
    %c1 = arith.constant 1 : index
    %c0_35 = arith.constant 0 : index
    %c0_36 = arith.constant 0 : index
    %52 = vector.load %arg3[%c1, %c0_35, %c0_36] : memref<3x64x8xf32, #tpu.memory_space<vmem>>, vector<1x64x8xf32>
    %53 = vector.shape_cast %52 : vector<1x64x8xf32> to vector<64x8xf32>
    %cst_37 = arith.constant dense<0.000000e+00> : vector<64x128xf32>
    %54 = tpu.matmul %53, %48, %cst_37 {dimension_numbers = #tpu.dot_dimension_numbers<[1], [0], [0], [1], [0, 0, 1, 1], [], []>} : vector<64x8xf32>, vector<8x128xf32>, vector<64x128xf32> -> vector<64x128xf32>
    %c1_38 = arith.constant 1 : index
    %c0_39 = arith.constant 0 : index
    %c0_40 = arith.constant 0 : index
    %55 = vector.load %arg4[%c1_38, %c0_39, %c0_40] : memref<3x64x1xf32, #tpu.memory_space<vmem>>, vector<1x64x1xf32>
    %56 = vector.shape_cast %55 : vector<1x64x1xf32> to vector<64x1xf32>
    %57 = vector.broadcast %56 : vector<64x1xf32> to vector<64x128xf32>
    %58 = arith.addf %54, %57 : vector<64x128xf32>
    %59 = arith.negf %58 : vector<64x128xf32>
    %60 = math.exp %59 : vector<64x128xf32>
    %cst_41 = arith.constant 1.000000e+00 : f32
    %61 = vector.broadcast %cst_41 : f32 to vector<64x128xf32>
    %62 = arith.addf %61, %60 : vector<64x128xf32>
    %63 = arith.divf %61, %62 : vector<64x128xf32>
    %c1_42 = arith.constant 1 : index
    %c0_43 = arith.constant 0 : index
    %c0_44 = arith.constant 0 : index
    %64 = vector.load %arg5[%c1_42, %c0_43, %c0_44] : memref<3x64x64xf32, #tpu.memory_space<vmem>>, vector<1x64x64xf32>
    %65 = vector.shape_cast %64 : vector<1x64x64xf32> to vector<64x64xf32>
    %cst_45 = arith.constant dense<0.000000e+00> : vector<64x128xf32>
    %66 = tpu.matmul %65, %63, %cst_45 {dimension_numbers = #tpu.dot_dimension_numbers<[1], [0], [0], [1], [0, 0, 1, 1], [], []>} : vector<64x64xf32>, vector<64x128xf32>, vector<64x128xf32> -> vector<64x128xf32>
    %c1_46 = arith.constant 1 : index
    %c0_47 = arith.constant 0 : index
    %c0_48 = arith.constant 0 : index
    %67 = vector.load %arg6[%c1_46, %c0_47, %c0_48] : memref<3x64x1xf32, #tpu.memory_space<vmem>>, vector<1x64x1xf32>
    %68 = vector.shape_cast %67 : vector<1x64x1xf32> to vector<64x1xf32>
    %69 = vector.broadcast %68 : vector<64x1xf32> to vector<64x128xf32>
    %70 = arith.addf %66, %69 : vector<64x128xf32>
    %71 = arith.negf %70 : vector<64x128xf32>
    %72 = math.exp %71 : vector<64x128xf32>
    %cst_49 = arith.constant 1.000000e+00 : f32
    %73 = vector.broadcast %cst_49 : f32 to vector<64x128xf32>
    %74 = arith.addf %73, %72 : vector<64x128xf32>
    %75 = arith.divf %73, %74 : vector<64x128xf32>
    %76 = vector.extract_strided_slice %75 {offsets = [0, 0], sizes = [32, 128], strides = [1, 1]} : vector<64x128xf32> to vector<32x128xf32>
    %77 = vector.extract_strided_slice %75 {offsets = [32, 0], sizes = [32, 128], strides = [1, 1]} : vector<64x128xf32> to vector<32x128xf32>
    %c1_50 = arith.constant 1 : index
    %c0_51 = arith.constant 0 : index
    %c0_52 = arith.constant 0 : index
    %78 = vector.load %arg7[%c1_50, %c0_51, %c0_52] : memref<3x8x32xf32, #tpu.memory_space<vmem>>, vector<1x8x32xf32>
    %79 = vector.shape_cast %78 : vector<1x8x32xf32> to vector<8x32xf32>
    %cst_53 = arith.constant dense<0.000000e+00> : vector<8x128xf32>
    %80 = tpu.matmul %79, %76, %cst_53 {dimension_numbers = #tpu.dot_dimension_numbers<[1], [0], [0], [1], [0, 0, 1, 1], [], []>} : vector<8x32xf32>, vector<32x128xf32>, vector<8x128xf32> -> vector<8x128xf32>
    %c1_54 = arith.constant 1 : index
    %c0_55 = arith.constant 0 : index
    %c0_56 = arith.constant 0 : index
    %81 = vector.load %arg8[%c1_54, %c0_55, %c0_56] : memref<3x8x1xf32, #tpu.memory_space<vmem>>, vector<1x8x1xf32>
    %82 = vector.shape_cast %81 : vector<1x8x1xf32> to vector<8x1xf32>
    %83 = vector.broadcast %82 : vector<8x1xf32> to vector<8x128xf32>
    %84 = arith.addf %80, %83 : vector<8x128xf32>
    %c1_57 = arith.constant 1 : index
    %c0_58 = arith.constant 0 : index
    %c0_59 = arith.constant 0 : index
    %85 = vector.load %arg9[%c1_57, %c0_58, %c0_59] : memref<3x8x32xf32, #tpu.memory_space<vmem>>, vector<1x8x32xf32>
    %86 = vector.shape_cast %85 : vector<1x8x32xf32> to vector<8x32xf32>
    %cst_60 = arith.constant dense<0.000000e+00> : vector<8x128xf32>
    %87 = tpu.matmul %86, %77, %cst_60 {dimension_numbers = #tpu.dot_dimension_numbers<[1], [0], [0], [1], [0, 0, 1, 1], [], []>} : vector<8x32xf32>, vector<32x128xf32>, vector<8x128xf32> -> vector<8x128xf32>
    %c1_61 = arith.constant 1 : index
    %c0_62 = arith.constant 0 : index
    %c0_63 = arith.constant 0 : index
    %88 = vector.load %arg10[%c1_61, %c0_62, %c0_63] : memref<3x8x1xf32, #tpu.memory_space<vmem>>, vector<1x8x1xf32>
    %89 = vector.shape_cast %88 : vector<1x8x1xf32> to vector<8x1xf32>
    %90 = vector.broadcast %89 : vector<8x1xf32> to vector<8x128xf32>
    %91 = arith.addf %87, %90 : vector<8x128xf32>
    %92 = math.exp %84 : vector<8x128xf32>
    %93 = arith.mulf %3, %92 : vector<8x128xf32>
    %94 = arith.addf %93, %91 : vector<8x128xf32>
    %cst_64 = arith.constant dense<0.000000e+00> : vector<128xf32>
    %95 = vector.multi_reduction <add>, %84, %cst_64 [0] : vector<8x128xf32> to vector<128xf32>
    %96 = vector.shape_cast %95 : vector<128xf32> to vector<1x128xf32>
    %97 = arith.addf %51, %96 : vector<1x128xf32>
    %c2 = arith.constant 2 : index
    %c0_65 = arith.constant 0 : index
    %c0_66 = arith.constant 0 : index
    %98 = vector.load %arg3[%c2, %c0_65, %c0_66] : memref<3x64x8xf32, #tpu.memory_space<vmem>>, vector<1x64x8xf32>
    %99 = vector.shape_cast %98 : vector<1x64x8xf32> to vector<64x8xf32>
    %cst_67 = arith.constant dense<0.000000e+00> : vector<64x128xf32>
    %100 = tpu.matmul %99, %94, %cst_67 {dimension_numbers = #tpu.dot_dimension_numbers<[1], [0], [0], [1], [0, 0, 1, 1], [], []>} : vector<64x8xf32>, vector<8x128xf32>, vector<64x128xf32> -> vector<64x128xf32>
    %c2_68 = arith.constant 2 : index
    %c0_69 = arith.constant 0 : index
    %c0_70 = arith.constant 0 : index
    %101 = vector.load %arg4[%c2_68, %c0_69, %c0_70] : memref<3x64x1xf32, #tpu.memory_space<vmem>>, vector<1x64x1xf32>
    %102 = vector.shape_cast %101 : vector<1x64x1xf32> to vector<64x1xf32>
    %103 = vector.broadcast %102 : vector<64x1xf32> to vector<64x128xf32>
    %104 = arith.addf %100, %103 : vector<64x128xf32>
    %105 = arith.negf %104 : vector<64x128xf32>
    %106 = math.exp %105 : vector<64x128xf32>
    %cst_71 = arith.constant 1.000000e+00 : f32
    %107 = vector.broadcast %cst_71 : f32 to vector<64x128xf32>
    %108 = arith.addf %107, %106 : vector<64x128xf32>
    %109 = arith.divf %107, %108 : vector<64x128xf32>
    %c2_72 = arith.constant 2 : index
    %c0_73 = arith.constant 0 : index
    %c0_74 = arith.constant 0 : index
    %110 = vector.load %arg5[%c2_72, %c0_73, %c0_74] : memref<3x64x64xf32, #tpu.memory_space<vmem>>, vector<1x64x64xf32>
    %111 = vector.shape_cast %110 : vector<1x64x64xf32> to vector<64x64xf32>
    %cst_75 = arith.constant dense<0.000000e+00> : vector<64x128xf32>
    %112 = tpu.matmul %111, %109, %cst_75 {dimension_numbers = #tpu.dot_dimension_numbers<[1], [0], [0], [1], [0, 0, 1, 1], [], []>} : vector<64x64xf32>, vector<64x128xf32>, vector<64x128xf32> -> vector<64x128xf32>
    %c2_76 = arith.constant 2 : index
    %c0_77 = arith.constant 0 : index
    %c0_78 = arith.constant 0 : index
    %113 = vector.load %arg6[%c2_76, %c0_77, %c0_78] : memref<3x64x1xf32, #tpu.memory_space<vmem>>, vector<1x64x1xf32>
    %114 = vector.shape_cast %113 : vector<1x64x1xf32> to vector<64x1xf32>
    %115 = vector.broadcast %114 : vector<64x1xf32> to vector<64x128xf32>
    %116 = arith.addf %112, %115 : vector<64x128xf32>
    %117 = arith.negf %116 : vector<64x128xf32>
    %118 = math.exp %117 : vector<64x128xf32>
    %cst_79 = arith.constant 1.000000e+00 : f32
    %119 = vector.broadcast %cst_79 : f32 to vector<64x128xf32>
    %120 = arith.addf %119, %118 : vector<64x128xf32>
    %121 = arith.divf %119, %120 : vector<64x128xf32>
    %122 = vector.extract_strided_slice %121 {offsets = [0, 0], sizes = [32, 128], strides = [1, 1]} : vector<64x128xf32> to vector<32x128xf32>
    %123 = vector.extract_strided_slice %121 {offsets = [32, 0], sizes = [32, 128], strides = [1, 1]} : vector<64x128xf32> to vector<32x128xf32>
    %c2_80 = arith.constant 2 : index
    %c0_81 = arith.constant 0 : index
    %c0_82 = arith.constant 0 : index
    %124 = vector.load %arg7[%c2_80, %c0_81, %c0_82] : memref<3x8x32xf32, #tpu.memory_space<vmem>>, vector<1x8x32xf32>
    %125 = vector.shape_cast %124 : vector<1x8x32xf32> to vector<8x32xf32>
    %cst_83 = arith.constant dense<0.000000e+00> : vector<8x128xf32>
    %126 = tpu.matmul %125, %122, %cst_83 {dimension_numbers = #tpu.dot_dimension_numbers<[1], [0], [0], [1], [0, 0, 1, 1], [], []>} : vector<8x32xf32>, vector<32x128xf32>, vector<8x128xf32> -> vector<8x128xf32>
    %c2_84 = arith.constant 2 : index
    %c0_85 = arith.constant 0 : index
    %c0_86 = arith.constant 0 : index
    %127 = vector.load %arg8[%c2_84, %c0_85, %c0_86] : memref<3x8x1xf32, #tpu.memory_space<vmem>>, vector<1x8x1xf32>
    %128 = vector.shape_cast %127 : vector<1x8x1xf32> to vector<8x1xf32>
    %129 = vector.broadcast %128 : vector<8x1xf32> to vector<8x128xf32>
    %130 = arith.addf %126, %129 : vector<8x128xf32>
    %c2_87 = arith.constant 2 : index
    %c0_88 = arith.constant 0 : index
    %c0_89 = arith.constant 0 : index
    %131 = vector.load %arg9[%c2_87, %c0_88, %c0_89] : memref<3x8x32xf32, #tpu.memory_space<vmem>>, vector<1x8x32xf32>
    %132 = vector.shape_cast %131 : vector<1x8x32xf32> to vector<8x32xf32>
    %cst_90 = arith.constant dense<0.000000e+00> : vector<8x128xf32>
    %133 = tpu.matmul %132, %123, %cst_90 {dimension_numbers = #tpu.dot_dimension_numbers<[1], [0], [0], [1], [0, 0, 1, 1], [], []>} : vector<8x32xf32>, vector<32x128xf32>, vector<8x128xf32> -> vector<8x128xf32>
    %c2_91 = arith.constant 2 : index
    %c0_92 = arith.constant 0 : index
    %c0_93 = arith.constant 0 : index
    %134 = vector.load %arg10[%c2_91, %c0_92, %c0_93] : memref<3x8x1xf32, #tpu.memory_space<vmem>>, vector<1x8x1xf32>
    %135 = vector.shape_cast %134 : vector<1x8x1xf32> to vector<8x1xf32>
    %136 = vector.broadcast %135 : vector<8x1xf32> to vector<8x128xf32>
    %137 = arith.addf %133, %136 : vector<8x128xf32>
    %138 = math.exp %130 : vector<8x128xf32>
    %139 = arith.mulf %48, %138 : vector<8x128xf32>
    %140 = arith.addf %139, %137 : vector<8x128xf32>
    %cst_94 = arith.constant dense<0.000000e+00> : vector<128xf32>
    %141 = vector.multi_reduction <add>, %130, %cst_94 [0] : vector<8x128xf32> to vector<128xf32>
    %142 = vector.shape_cast %141 : vector<128xf32> to vector<1x128xf32>
    %143 = arith.addf %97, %142 : vector<1x128xf32>
    %c0_95 = arith.constant 0 : index
    %c0_96 = arith.constant 0 : index
    %144 = vector.load %arg11[%c0_95, %c0_96] : memref<16x128xf32, #tpu.memory_space<vmem>>, vector<8x128xf32>
    tpu.vector_store %arg11[%c0_95, %c0_96], %94 {strides = array<i32>} : memref<16x128xf32, #tpu.memory_space<vmem>>, vector<8x128xf32>,
    %c8 = arith.constant 8 : index
    %c0_97 = arith.constant 0 : index
    %145 = vector.load %arg11[%c8, %c0_97] : memref<16x128xf32, #tpu.memory_space<vmem>>, vector<8x128xf32>
    tpu.vector_store %arg11[%c8, %c0_97], %140 {strides = array<i32>} : memref<16x128xf32, #tpu.memory_space<vmem>>, vector<8x128xf32>,
    %146 = arith.mulf %94, %94 : vector<8x128xf32>
    %cst_98 = arith.constant dense<0.000000e+00> : vector<128xf32>
    %147 = vector.multi_reduction <add>, %146, %cst_98 [0] : vector<8x128xf32> to vector<128xf32>
    %148 = vector.shape_cast %147 : vector<128xf32> to vector<1x128xf32>
    %149 = arith.mulf %140, %140 : vector<8x128xf32>
    %cst_99 = arith.constant dense<0.000000e+00> : vector<128xf32>
    %150 = vector.multi_reduction <add>, %149, %cst_99 [0] : vector<8x128xf32> to vector<128xf32>
    %151 = vector.shape_cast %150 : vector<128xf32> to vector<1x128xf32>
    %152 = arith.addf %148, %151 : vector<1x128xf32>
    %cst_100 = arith.constant -5.000000e-01 : f32
    %153 = vector.broadcast %cst_100 : f32 to vector<1x128xf32>
    %154 = arith.mulf %153, %152 : vector<1x128xf32>
    %cst_101 = arith.constant 14.7030163 : f32
    %155 = vector.broadcast %cst_101 : f32 to vector<1x128xf32>
    %156 = arith.subf %154, %155 : vector<1x128xf32>
    %157 = tpu.concatenate %156, %143 in 0 : vector<1x128xf32>, vector<1x128xf32> -> vector<2x128xf32>
    %c0_102 = arith.constant 0 : index
    %c0_103 = arith.constant 0 : index
    %158 = vector.load %arg12[%c0_102, %c0_103] : memref<2x128xf32, #tpu.memory_space<vmem>>, vector<2x128xf32>
    tpu.vector_store %arg12[%c0_102, %c0_103], %157 {strides = array<i32>} : memref<2x128xf32, #tpu.memory_space<vmem>>, vector<2x128xf32>,
    return
  }
  func.func @transform_0(%arg0: i32) -> (i32, i32) {
    %c0_i32 = arith.constant 0 : i32
    %c0_i32_0 = arith.constant 0 : i32
    return %c0_i32, %arg0 : i32, i32
  }
  func.func @transform_1(%arg0: i32) -> (i32, i32) {
    %c0_i32 = arith.constant 0 : i32
    %c0_i32_0 = arith.constant 0 : i32
    %c0_i32_1 = arith.constant 0 : i32
    return %c0_i32, %c0_i32_0 : i32, i32
  }
  func.func @transform_2(%arg0: i32) -> (i32, i32, i32) {
    %c0_i32 = arith.constant 0 : i32
    %c0_i32_0 = arith.constant 0 : i32
    %c0_i32_1 = arith.constant 0 : i32
    %c0_i32_2 = arith.constant 0 : i32
    return %c0_i32, %c0_i32_0, %c0_i32_1 : i32, i32, i32
  }
  func.func @transform_3(%arg0: i32) -> (i32, i32, i32) {
    %c0_i32 = arith.constant 0 : i32
    %c0_i32_0 = arith.constant 0 : i32
    %c0_i32_1 = arith.constant 0 : i32
    %c0_i32_2 = arith.constant 0 : i32
    return %c0_i32, %c0_i32_0, %c0_i32_1 : i32, i32, i32
  }
  func.func @transform_4(%arg0: i32) -> (i32, i32, i32) {
    %c0_i32 = arith.constant 0 : i32
    %c0_i32_0 = arith.constant 0 : i32
    %c0_i32_1 = arith.constant 0 : i32
    %c0_i32_2 = arith.constant 0 : i32
    return %c0_i32, %c0_i32_0, %c0_i32_1 : i32, i32, i32
  }
  func.func @transform_5(%arg0: i32) -> (i32, i32, i32) {
    %c0_i32 = arith.constant 0 : i32
    %c0_i32_0 = arith.constant 0 : i32
    %c0_i32_1 = arith.constant 0 : i32
    %c0_i32_2 = arith.constant 0 : i32
    return %c0_i32, %c0_i32_0, %c0_i32_1 : i32, i32, i32
  }
  func.func @transform_6(%arg0: i32) -> (i32, i32, i32) {
    %c0_i32 = arith.constant 0 : i32
    %c0_i32_0 = arith.constant 0 : i32
    %c0_i32_1 = arith.constant 0 : i32
    %c0_i32_2 = arith.constant 0 : i32
    return %c0_i32, %c0_i32_0, %c0_i32_1 : i32, i32, i32
  }
  func.func @transform_7(%arg0: i32) -> (i32, i32, i32) {
    %c0_i32 = arith.constant 0 : i32
    %c0_i32_0 = arith.constant 0 : i32
    %c0_i32_1 = arith.constant 0 : i32
    %c0_i32_2 = arith.constant 0 : i32
    return %c0_i32, %c0_i32_0, %c0_i32_1 : i32, i32, i32
  }
  func.func @transform_8(%arg0: i32) -> (i32, i32, i32) {
    %c0_i32 = arith.constant 0 : i32
    %c0_i32_0 = arith.constant 0 : i32
    %c0_i32_1 = arith.constant 0 : i32
    %c0_i32_2 = arith.constant 0 : i32
    return %c0_i32, %c0_i32_0, %c0_i32_1 : i32, i32, i32
  }
  func.func @transform_9(%arg0: i32) -> (i32, i32, i32) {
    %c0_i32 = arith.constant 0 : i32
    %c0_i32_0 = arith.constant 0 : i32
    %c0_i32_1 = arith.constant 0 : i32
    %c0_i32_2 = arith.constant 0 : i32
    return %c0_i32, %c0_i32_0, %c0_i32_1 : i32, i32, i32
  }
  func.func @transform_10(%arg0: i32) -> (i32, i32) {
    %c0_i32 = arith.constant 0 : i32
    %c0_i32_0 = arith.constant 0 : i32
    return %c0_i32, %arg0 : i32, i32
  }
  func.func @transform_11(%arg0: i32) -> (i32, i32) {
    %c0_i32 = arith.constant 0 : i32
    %c0_i32_0 = arith.constant 0 : i32
    return %c0_i32, %arg0 : i32, i32
  }
}

</mosaic_0001>

<bundles_post_ra>
// kernel: fourier_flow_forward.1
= control target key start
LH: loop header
LB: loop body
LE: loop exit
PB: predicated region body
PF: predicated region fallthrough
CT: control target
= control target key end

     0   :  { %s4112_s0 = inlined_call_operand.vmem [shape: f32[16,256], index: 0, kind: input, shape index: {}]   ;;  %s4113_s1 = inlined_call_operand.vmem [shape: f32[16,16], index: 1, kind: input, shape index: {}]   ;;  %s4114_s2 = inlined_call_operand.vmem [shape: f32[3,64,8], index: 2, kind: input, shape index: {}]   ;;  %s4115_s3 = inlined_call_operand.vmem [shape: f32[3,64,1], index: 3, kind: input, shape index: {}]   ;;  %s4116_s4 = inlined_call_operand.vmem [shape: f32[3,64,64], index: 4, kind: input, shape index: {}]   ;;  %s4117_s5 = inlined_call_operand.vmem [shape: f32[3,64,1], index: 5, kind: input, shape index: {}]   ;;  %s4118_s6 = inlined_call_operand.vmem [shape: f32[3,8,32], index: 6, kind: input, shape index: {}]   ;;  %s4119_s7 = inlined_call_operand.vmem [shape: f32[3,8,1], index: 7, kind: input, shape index: {}]   ;;  %s4120_s8 = inlined_call_operand.vmem [shape: f32[3,8,32], index: 8, kind: input, shape index: {}]   ;;  %s4121_s9 = inlined_call_operand.vmem [shape: f32[3,8,1], index: 9, kind: input, shape index: {}]   ;;  %s4122_s10 = inlined_call_operand.hbm [shape: f32[16,256], index: 10, kind: output, shape index: {0}]   ;;  %s4123_s11 = inlined_call_operand.vmem [shape: f32[2,256], index: 11, kind: output, shape index: {1}]  }
   0x1   :  { %4125 = sst [smem:[#allocation6_spill]] %s4112_s0 }
   0x2   :  { %4126 = sst [smem:[#allocation7_spill]] %s4113_s1 }
   0x3   :  { %17 = vsyncpa [#allocation4], 0 }
   0x4   :  { %19 = vsyncpa [#allocation4 + $0x1], 0  ;;  %s3548_s17 = smov 0   ;;  %s3550_s18 = smov 0  }
   0x5   :  { %s3552_s19 = smov 0   ;;  %s3554_s20 = smov 0  }
   0x6 LB: > { %s3569_s21 = sadd.s32 4294967295, %s3478_s20   ;;  %s2584_s22 = sadd.s32 4294967294, %s3478_s20   ;;  %s3478_s20 = sphi %s3554_s20, %s4135_s20   ;;  %s3474_s19 = sphi %s3552_s19, %s4134_s19   ;;  %s3470_s18 = sphi %s3550_s18, %s4133_s18   ;;  %s3466_s17 = sphi %s3548_s17, %s4132_s17  }
   0x7   : > { %s3573_s23 = sadd.s32 1, %s3478_s20   ;;  %s32_s24 = sadd.s32 1, %s3474_s19 }
   0x8   : > { %s29_s25 = ssub.s32 %s3478_s20, %s3573_s23  ;;  %p39_p0 = scmp.ne.s32.totalorder %s3474_s19, %s3470_s18 }
   0x9   : > { %p30_p1 = scmp.eq.s32.totalorder %s29_s25, 0  ;;  %p40_p2 = scmp.eq.s32.totalorder %s3478_s20, 0 }
   0xa   : > { %p258_p3 = scmp.eq.s32.totalorder %s3569_s21, 1  ;;  %p263_p4 = scmp.ne.s32.totalorder %s3470_s18, %s3466_s17 }
   0xb   : > { %s3585_s26 = scalar_select %p30_p1, %s3474_s19, %s32_s24  }
   0xc   : > { %p41_p5 = por %p40_p2, %p39_p0  ;;  %p3587_p6 = por %p258_p3, %p39_p0 }
   0xd   : > { %p264_p7 = scmp.eq.s32.totalorder %s2584_s22, 1  ;;  %p2586_p9 = scmp.ge.s32.totalorder %s3478_s20, 2 }
   0xf   : > { %p3591_p8 = por %p264_p7, %p263_p4  ;;  %333 = sbr.rel (%p2586_p9) target bundleno = 33 (0x21), region = 52 }
  0x16   : > { %336 = sbr.rel (!%p41_p5) target bundleno = 33 (0x21), region = 56  ;;  %s338_s29 = sand.u32 (%p41_p5), 1, %s3474_s19  }
  0x17   : > { %s2588_s30 = sshll.u32 (%p41_p5), %s3478_s20, 3  ;;  %s2587_s12 = sshll.u32 (%p41_p5), %s338_s29, 4 }
  0x18   : > { %s4129_s0 = sld [smem:[#allocation6_spill]] (%p41_p5)  ;;  %s340_s16 = scalar_lea.vmem (%p41_p5), [#allocation2], %s2587_s12 }
  0x1e   : > { %s342_s15 = scalar_lea.vmem %s4129_s0, %s2588_s30 }
  0x1f   : > { %v372_v0 = vld [vmem:[%s342_s15] sm:$0xff]  ;;  %v374_v1 = vld [vmem:[%s342_s15 + $0x10] sm:$0xff] }
  0x20   : > { %373 = vst [vmem:[%s340_s16] sm:$0xff] %v372_v0  ;;  %375 = vst [vmem:[%s340_s16 + $0x8] sm:$0xff] %v374_v1 }
  0x21 PF: > { %p2589_p10 = scmp.ge.s32.totalorder %s3478_s20, 1  ;;  %p380_p11 = scmp.lt.s32.totalorder %s3478_s20, 3 }
  0x23   : > { %p381_p12 = pnand %p2589_p10, %p380_p11 }
  0x24   : > { %s4124_s22 = sand.u32 (!%p381_p12), 1, %s3470_s18   ;;  %s4130_s1 = sld [smem:[#allocation7_spill]] (!%p381_p12)  ;;  %vm438_vm0 = vcmask (!%p381_p12), 130048   ;;  %v528_v3 = vld [vmem:[%s4115_s3] sm:$0xff] (!%p381_p12)  ;;  %v3480_v4 = vmov (!%p381_p12), 0   ;;  %v530_v5 = vld [vmem:[%s4115_s3 + $0x10] sm:$0xff] (!%p381_p12) }
  0x25   : > { %384 = sbr.rel (%p381_p12) target bundleno = 2524 (0x9dc), region = 94  ;;  %s3614_s12 = sshll.u32 (!%p381_p12), %s4124_s22, 4  ;;  %3216 = vset.pattern.permute.xlu0 (!%p381_p12), %v3480_v4  ;;  %3217 = vset.pattern.permute.xlu1 (!%p381_p12), %v3480_v4  ;;  %v529_v8 = vld [vmem:[%s4115_s3 + $0x8] sm:$0xff] (!%p381_p12)  ;;  %v531_v10 = vld [vmem:[%s4115_s3 + $0x18] sm:$0xff] (!%p381_p12)  ;;  %v532_v12 = vld [vmem:[%s4115_s3 + $0x20] sm:$0xff] (!%p381_p12)  ;;  %vm576_vm1 = vcmask (!%p381_p12), 64512  }
  0x26   : > { %538 = vperm.xlu0 (!%p381_p12), %3216, %v528_v3   ;;  %s389_s15 = scalar_lea.vmem (!%p381_p12), [#allocation2], %s3614_s12  ;;  %548 = vperm.xlu1 (!%p381_p12), %3217, %v530_v5   ;;  %v533_v13 = vld [vmem:[%s4115_s3 + $0x28] sm:$0xff] (!%p381_p12)  ;;  %v534_v14 = vld [vmem:[%s4115_s3 + $0x30] sm:$0xff] (!%p381_p12)  ;;  %v535_v15 = vld [vmem:[%s4115_s3 + $0x38] sm:$0xff] (!%p381_p12)  ;;  %vm810_vm2 = vcmask (!%p381_p12), 523264   ;;  %vm3482_vm3 = vmmov (!%p381_p12), 0  }
  0x27   : > { %v434_v6 = vld [vmem:[%s389_s15] sm:$0xff] (!%p381_p12)  ;;  %v435_v7 = vld [vmem:[%s389_s15 + $0x8] sm:$0xff] (!%p381_p12)  ;;  %vm995_vm4 = vcmask (!%p381_p12), 261120   ;;  %s3970_s29 = scalar_lea.vmem (!%p381_p12), [#allocation3], %s3614_s12  ;;  %s2771_s12 = sshll.u32 (!%p381_p12), %s3569_s21, 7 }
  0x28   : > { %v3082_v9 = vpack.c.bf16 (!%p381_p12), %v435_v7, %v434_v6  ;;  %v762_v16 = vld [vmem:[%s4117_s5] sm:$0xff] (!%p381_p12)  ;;  %v763_v17 = vld [vmem:[%s4117_s5 + $0x8] sm:$0xff] (!%p381_p12)  ;;  %v764_v18 = vld [vmem:[%s4117_s5 + $0x10] sm:$0xff] (!%p381_p12)  ;;  %s2489_s14 = sshll.u32 (!%p381_p12), %s3970_s29, 4  ;;  %s4060_s15 = scalar_lea.hbm (!%p381_p12), %s4122_s10, %s2771_s12  ;;  %s4054_s14 = int_to_ptr.vmem [resolvable:$true] %s2489_s14 }
  0x29   : > { %v520_v19 = vld [vmem:[%s4114_s2] sm:$0xff] (!%p381_p12)  ;;  %v765_v20 = vld [vmem:[%s4117_s5 + $0x18] sm:$0xff] (!%p381_p12)  ;;  %v767_v22 = vld [vmem:[%s4117_s5 + $0x28] sm:$0xff] (!%p381_p12)  ;;  %s4131_s16 = sand.u32 (!%p381_p12), 1, %s3470_s18   ;;  %s3416_s25 = scalar_lea.vmem (!%p381_p12), %s4054_s14, 256 }
  0x2a   : > { %v436_v2 = vld [vmem:[%s4130_s1] sm:$0xff] (!%p381_p12)  ;;  %3083 = vmatprep.subr.bf16.mxu0 (!%p381_p12), %v3082_v9  ;;  %543 = vperm.xlu0 (!%p381_p12), %3216, %v529_v8   ;;  %v437_v11 = vld [vmem:[%s4130_s1 + $0x8] sm:$0xff] (!%p381_p12)  ;;  %v768_v23 = vld [vmem:[%s4117_s5 + $0x30] sm:$0xff] (!%p381_p12)  ;;  %s4065_s24 = scalar_lea.sflag (!%p381_p12), [#allocation4], %s4131_s16  ;;  %p3417_p13 = scmp.ne.s32.totalorder (!%p381_p12), %s4054_s14, %s3416_s25 }
  0x2b   : > { %2887 = vmatprep.mubr.msk.f32.mxu0 (!%p381_p12), %vm438_vm0, %v436_v2  ;;  %3085 = vmatpush3.bf16.msra.mxu0 (!%p381_p12), %v3082_v9  ;;  %v766_v21 = vld [vmem:[%s4117_s5 + $0x20] sm:$0xff] (!%p381_p12)  ;;  %v769_v24 = vld [vmem:[%s4117_s5 + $0x38] sm:$0xff] (!%p381_p12)  ;;  %v2638_v28 = vld [vmem:[%s4115_s3 + $0x48] sm:$0xff] (!%p381_p12)  ;;  %s3484_s30 = smov (!%p381_p12), [#allocation3]  }
  0x2c   : > { %553 = vperm.xlu1 %3217, %v531_v10   ;;  %2892 = vmatprep.mubr.msk.f32.mxu1 %vm576_vm1, %v520_v19  ;;  %v989_v25 = vld [vmem:[%s4119_s7] sm:$0xff]  ;;  %v2639_v29 = vld [vmem:[%s4115_s3 + $0x50] sm:$0xff]  ;;  %v2640_v30 = vld [vmem:[%s4115_s3 + $0x58] sm:$0xff]  ;;  %p3418_p0 = pnand %p3417_p13, %p3587_p6  ;;  %s3420_s13 = sshll.u32 %s3484_s30, 4  ;;  %s3421_s13 = int_to_ptr.vmem [resolvable:$false] %s3420_s13 }
  0x2d   : > { %v1070_v26 = vld [vmem:[%s4121_s9] sm:$0xff]  ;;  %v2642_v32 = vld [vmem:[%s4115_s3 + $0x68] sm:$0xff]  ;;  %v2643_v33 = vld [vmem:[%s4115_s3 + $0x70] sm:$0xff]  ;;  %s3422_s1 = scalar_lea.vmem %s3421_s13, 512  ;;  %p3423_p2 = scmp.lt.s32.totalorder %s4054_s14, %s3421_s13 }
  0x2e   : > { %2888 = vmatmul.mubr.msk.f32.vlgmr.msra.gmra.mrb[0].mxu0 %vm438_vm0, %v437_v11  ;;  %558 = vperm.xlu0 %3216, %v532_v12   ;;  %v2637_v27 = vld [vmem:[%s4115_s3 + $0x40] sm:$0xff]  ;;  %v2644_v34 = vld [vmem:[%s4115_s3 + $0x78] sm:$0xff]  ;;  %v2670_v36 = vld [vmem:[%s4117_s5 + $0x48] sm:$0xff]  ;;  %p3419_p1 = pneg %p3418_p0  ;;  %p3424_p3 = scmp.lt.s32.totalorder %s3422_s1, %s3416_s25 }
  0x2f   : > { %v2641_v31 = vld [vmem:[%s4115_s3 + $0x60] sm:$0xff]  ;;  %v2671_v37 = vld [vmem:[%s4117_s5 + $0x50] sm:$0xff]  ;;  %v2672_v38 = vld [vmem:[%s4117_s5 + $0x58] sm:$0xff] }
  0x30   : > { %563 = vperm.xlu1 %3217, %v533_v13   ;;  %v2669_v35 = vld [vmem:[%s4117_s5 + $0x40] sm:$0xff]  ;;  %v2674_v40 = vld [vmem:[%s4117_s5 + $0x68] sm:$0xff]  ;;  %v2675_v41 = vld [vmem:[%s4117_s5 + $0x70] sm:$0xff]  ;;  %p3425_p4 = por %p3424_p3, %p3423_p2 }
  0x31   : > { %v2673_v39 = vld [vmem:[%s4117_s5 + $0x60] sm:$0xff]  ;;  %v2676_v42 = vld [vmem:[%s4117_s5 + $0x78] sm:$0xff]  ;;  %v2694_v43 = vld [vmem:[%s4119_s7 + $0x8] sm:$0xff] }
  0x32   : > { %568 = vperm.xlu0 %3216, %v534_v14   ;;  %v2697_v44 = vld [vmem:[%s4121_s9 + $0x8] sm:$0xff]  ;;  %v2707_v45 = vld [vmem:[%s4115_s3 + $0x80] sm:$0xff]  ;;  %v2709_v47 = vld [vmem:[%s4115_s3 + $0x90] sm:$0xff]  ;;  %p3426_p5 = pnand %p3425_p4, %p3419_p1 }
  0x33   : > { %v2708_v46 = vld [vmem:[%s4115_s3 + $0x88] sm:$0xff]  ;;  %v2710_v48 = vld [vmem:[%s4115_s3 + $0x98] sm:$0xff]  ;;  %v2711_v49 = vld [vmem:[%s4115_s3 + $0xa0] sm:$0xff] }
  0x34   : > { %573 = vperm.xlu1 %3217, %v535_v15   ;;  %v2712_v50 = vld [vmem:[%s4115_s3 + $0xa8] sm:$0xff]  ;;  %v2713_v51 = vld [vmem:[%s4115_s3 + $0xb0] sm:$0xff]  ;;  %v2714_v52 = vld [vmem:[%s4115_s3 + $0xb8] sm:$0xff] }
  0x35   : > { %v2739_v53 = vld [vmem:[%s4117_s5 + $0x80] sm:$0xff]  ;;  %v2740_v54 = vld [vmem:[%s4117_s5 + $0x88] sm:$0xff]  ;;  %v2741_v55 = vld [vmem:[%s4117_s5 + $0x90] sm:$0xff] }
  0x36   : > { %772 = vperm.xlu0 %3216, %v762_v16   ;;  %v2742_v56 = vld [vmem:[%s4117_s5 + $0x98] sm:$0xff]  ;;  %v2743_v57 = vld [vmem:[%s4117_s5 + $0xa0] sm:$0xff]  ;;  %v2744_v58 = vld [vmem:[%s4117_s5 + $0xa8] sm:$0xff] }
  0x37   : > { %v2745_v59 = vld [vmem:[%s4117_s5 + $0xb0] sm:$0xff]  ;;  %v2746_v60 = vld [vmem:[%s4117_s5 + $0xb8] sm:$0xff]  ;;  %v521_v1 = vld [vmem:[%s4114_s2 + $0x8] sm:$0xff] }
  0x38   : > { %777 = vperm.xlu1 %3217, %v763_v17   ;;  %v2764_v61 = vld [vmem:[%s4119_s7 + $0x10] sm:$0xff]  ;;  %v523_v3 = vld [vmem:[%s4114_s2 + $0x18] sm:$0xff]  ;;  %v524_v4 = vld [vmem:[%s4114_s2 + $0x20] sm:$0xff] }
  0x39   : > { %v2767_v62 = vld [vmem:[%s4121_s9 + $0x10] sm:$0xff]  ;;  %v525_v5 = vld [vmem:[%s4114_s2 + $0x28] sm:$0xff]  ;;  %v527_v7 = vld [vmem:[%s4114_s2 + $0x38] sm:$0xff] }
  0x3a   : > { %782 = vperm.xlu0 %3216, %v764_v18   ;;  %v522_v2 = vld [vmem:[%s4114_s2 + $0x10] sm:$0xff]  ;;  %v754_v8 = vld [vmem:[%s4116_s4] sm:$0xff] }
  0x3b   : > { %v526_v6 = vld [vmem:[%s4114_s2 + $0x30] sm:$0xff] }
  0x3c   : > { %787 = vperm.xlu1 %3217, %v765_v20  }
  0x3e   : > { %792 = vperm.xlu0 %3216, %v766_v21  }
  0x40   : > { %797 = vperm.xlu1 %3217, %v767_v22  }
  0x42   : > { %802 = vperm.xlu0 %3216, %v768_v23  }
  0x44   : > { %807 = vperm.xlu1 %3217, %v769_v24  }
  0x46   : > { %992 = vperm.xlu0 %3216, %v989_v25  }
  0x48   : > { %1073 = vperm.xlu1 %3217, %v1070_v26  }
  0x4a   : > { %1180 = vperm.xlu0 %3216, %v2637_v27  }
  0x4c   : > { %1185 = vperm.xlu1 %3217, %v2638_v28  }
  0x4e   : > { %1190 = vperm.xlu0 %3216, %v2639_v29  }
  0x50   : > { %1195 = vperm.xlu1 %3217, %v2640_v30  }
  0x52   : > { %1200 = vperm.xlu0 %3216, %v2641_v31  }
  0x54   : > { %1205 = vperm.xlu1 %3217, %v2642_v32  }
  0x56   : > { %1210 = vperm.xlu0 %3216, %v2643_v33  }
  0x58   : > { %1215 = vperm.xlu1 %3217, %v2644_v34  }
  0x5a   : > { %1415 = vperm.xlu0 %3216, %v2669_v35  }
  0x5c   : > { %1420 = vperm.xlu1 %3217, %v2670_v36  }
  0x5e   : > { %1425 = vperm.xlu0 %3216, %v2671_v37  }
  0x60   : > { %1430 = vperm.xlu1 %3217, %v2672_v38  }
  0x62   : > { %1435 = vperm.xlu0 %3216, %v2673_v39  }
  0x64   : > { %1440 = vperm.xlu1 %3217, %v2674_v40  }
  0x66   : > { %1445 = vperm.xlu0 %3216, %v2675_v41  }
  0x68   : > { %1450 = vperm.xlu1 %3217, %v2676_v42  }
  0x6a   : > { %1636 = vperm.xlu0 %3216, %v2694_v43  }
  0x6c   : > { %1718 = vperm.xlu1 %3217, %v2697_v44  }
  0x6e   : > { %1825 = vperm.xlu0 %3216, %v2707_v45  }
  0x70   : > { %1830 = vperm.xlu1 %3217, %v2708_v46  }
  0x72   : > { %1835 = vperm.xlu0 %3216, %v2709_v47  }
  0x74   : > { %1840 = vperm.xlu1 %3217, %v2710_v48  }
  0x76   : > { %1845 = vperm.xlu0 %3216, %v2711_v49  }
  0x78   : > { %1850 = vperm.xlu1 %3217, %v2712_v50  }
  0x7a   : > { %1855 = vperm.xlu0 %3216, %v2713_v51  }
  0x7c   : > { %1860 = vperm.xlu1 %3217, %v2714_v52  }
  0x7e   : > { %2060 = vperm.xlu0 %3216, %v2739_v53  }
  0x80   : > { %2065 = vperm.xlu1 %3217, %v2740_v54  }
  0x82   : > { %2070 = vperm.xlu0 %3216, %v2741_v55  }
  0x84   : > { %2075 = vperm.xlu1 %3217, %v2742_v56  }
  0x86   : > { %2080 = vperm.xlu0 %3216, %v2743_v57  }
  0x88   : > { %2085 = vperm.xlu1 %3217, %v2744_v58  }
  0x8a   : > { %2090 = vperm.xlu0 %3216, %v2745_v59  }
  0x8c   : > { %2095 = vperm.xlu1 %3217, %v2746_v60  }
  0x8e   : > { %2281 = vperm.xlu0 %3216, %v2764_v61  }
  0x90   : > { %2363 = vperm.xlu1 %3217, %v2767_v62  }
  0xa5   : > { %v539_v9 = vpop.permute.xlu0 %538  ;;  %v549_v10 = vpop.permute.xlu1 %548 }
  0xa9   : > { %v544_v11 = vpop.permute.xlu0 %543 }
  0xab   : > { %v554_v12 = vpop.permute.xlu1 %553 }
  0xad   : > { %v559_v24 = vpop.permute.xlu0 %558 }
  0xaf   : > { %v564_v22 = vpop.permute.xlu1 %563 }
  0xb1   : > { %v569_v35 = vpop.permute.xlu0 %568 }
  0xb3   : > { %v574_v32 = vpop.permute.xlu1 %573 }
 0x101   : > { %v3785_v63 = vpop.f32.mrb[0].mxu0 }
 0x102   : > { %v3787_v0 = vpop.f32.mrb[1].mxu0 }
 0x103   : > { %2890 = vmatprep.subr.mxu1 %v3787_v0 }
 0x104   : > { %2891 = vmatpush3.msra.mxu1 %v3787_v0 }
 0x105   : > { %2893 = vmatmul.mubr.msk.f32.vlgmr.msra.gmra.mrb[0].mxu1 %vm576_vm1, %v521_v1 }
 0x106   : > { %2895 = vmatprep.mubr.msk.f32.mxu1 %vm576_vm1, %v522_v2 }
 0x109   : > { %2896 = vmatmul.mubr.msk.f32.gmra.mrb[2].mxu1 %vm576_vm1, %v523_v3 }
 0x10a   : > { %2898 = vmatprep.mubr.msk.f32.mxu1 %vm576_vm1, %v524_v4 }
 0x10d   : > { %2899 = vmatmul.mubr.msk.f32.gmra.mrb[4].mxu1 %vm576_vm1, %v525_v5 }
 0x10e   : > { %2901 = vmatprep.mubr.msk.f32.mxu1 %vm576_vm1, %v526_v6 }
 0x111   : > { %2902 = vmatmul.mubr.msk.f32.gmra.mrb[6].mxu1 %vm576_vm1, %v527_v7  ;;  %v755_v7 = vld [vmem:[%s4116_s4 + $0x8] sm:$0xff] }
 0x112   : > { %2920 = vmatprep.mubr.msk.f32.mxu1 %vm810_vm2, %v754_v8  ;;  %v756_v8 = vld [vmem:[%s4116_s4 + $0x10] sm:$0xff] }
 0x1d8   : > { %v2894_v13 = vpop.f32.mrb[0].mxu1 }
 0x1d9   : > { %v673_v14 = vadd.f32 %v2894_v13, %v544_v11  ;;  %v667_v15 = vpop.f32.mrb[1].mxu1  ;;  %v759_v11 = vld [vmem:[%s4116_s4 + $0x28] sm:$0xff]  ;;  %v761_v13 = vld [vmem:[%s4116_s4 + $0x38] sm:$0xff] }
 0x1da   : > { %v668_v16 = vadd.f32 %v667_v15, %v539_v9  ;;  %v757_v9 = vld [vmem:[%s4116_s4 + $0x18] sm:$0xff]  ;;  %v3483_v15 = vmov 0.0  }
 0x1db   : > { %v2604_v17 = vmul.f32 -1.442695, %v673_v14  ;;  %v3481_v14 = vmov 0.0|0.0   ;;  %2940 = vmatprep.mubr.msk.f32.mxu0 %vm3482_vm3, %v3483_v15 }
 0x1dc   : > { %v2603_v18 = vmul.f32 -1.442695, %v668_v16  ;;  %v2897_v19 = vpop.f32.mrb[2].mxu1  ;;  %3102 = vmatprep.subr.bf16.mxu0 %v3481_v14  ;;  %v778_v16 = vpop.permute.xlu1 %777 }
 0x1dd   : > { %3218 = vpow2.f32 %v2604_v17  ;;  %v683_v20 = vadd.f32 %v2897_v19, %v554_v12  ;;  %v677_v21 = vpop.f32.mrb[3].mxu1  ;;  %v760_v12 = vld [vmem:[%s4116_s4 + $0x30] sm:$0xff]  ;;  %v773_v17 = vpop.permute.xlu0 %772 }
 0x1de   : > { %3220 = vpow2.f32 %v2603_v18  ;;  %v678_v23 = vadd.f32 %v677_v21, %v549_v10  ;;  %v758_v10 = vld [vmem:[%s4116_s4 + $0x20] sm:$0xff] }
 0x1df   : > { %v2606_v25 = vmul.f32 -1.442695, %v683_v20 }
 0x1e0   : > { %v2605_v26 = vmul.f32 -1.442695, %v678_v23  ;;  %v2900_v27 = vpop.f32.mrb[4].mxu1  ;;  %v788_v18 = vpop.permute.xlu1 %787 }
 0x1e1   : > { %3222 = vpow2.f32 %v2606_v25  ;;  %v693_v28 = vadd.f32 %v2900_v27, %v564_v22  ;;  %v687_v29 = vpop.f32.mrb[5].mxu1  ;;  %v783_v20 = vpop.permute.xlu0 %782 }
 0x1e2   : > { %3224 = vpow2.f32 %v2605_v26  ;;  %v688_v30 = vadd.f32 %v687_v29, %v559_v24 }
 0x1e3   : > { %v2608_v31 = vmul.f32 -1.442695, %v693_v28 }
 0x1e4   : > { %v2607_v33 = vmul.f32 -1.442695, %v688_v30  ;;  %v2903_v34 = vpop.f32.mrb[6].mxu1  ;;  %v798_v29 = vpop.permute.xlu1 %797 }
 0x1e5   : > { %3226 = vpow2.f32 %v2608_v31  ;;  %v703_v36 = vadd.f32 %v2903_v34, %v574_v32  ;;  %v697_v37 = vpop.f32.mrb[7].mxu1  ;;  %v793_v31 = vpop.permute.xlu0 %792 }
 0x1e6   : > { %3228 = vpow2.f32 %v2607_v33  ;;  %v698_v38 = vadd.f32 %v697_v37, %v569_v35 }
 0x1e7   : > { %v3219_v39 = vpop.eup %3218  ;;  %v2610_v40 = vmul.f32 -1.442695, %v703_v36 }
 0x1e8   : > { %v3221_v41 = vpop.eup %3220  ;;  %v731_v42 = vadd.f32 1.0, %v3219_v39  ;;  %v2609_v43 = vmul.f32 -1.442695, %v698_v38  ;;  %v808_v39 = vpop.permute.xlu1 %807 }
 0x1e9   : > { %v730_v44 = vadd.f32 1.0, %v3221_v41  ;;  %3230 = vpow2.f32 %v2610_v40 }
 0x1ea   : > { %3232 = vrcp.f32 %v731_v42  ;;  %v803_v42 = vpop.permute.xlu0 %802 }
 0x1eb   : > { %v3223_v45 = vpop.eup %3222  ;;  %3234 = vrcp.f32 %v730_v44 }
 0x1ec   : > { %v3225_v46 = vpop.eup %3224  ;;  %v733_v47 = vadd.f32 1.0, %v3223_v45  ;;  %3236 = vpow2.f32 %v2609_v43 }
 0x1ed   : > { %v732_v48 = vadd.f32 1.0, %v3225_v46 }
 0x1ee   : > { %3238 = vrcp.f32 %v733_v47 }
 0x1ef   : > { %v3227_v49 = vpop.eup %3226  ;;  %3240 = vrcp.f32 %v732_v48 }
 0x1f0   : > { %v3229_v50 = vpop.eup %3228  ;;  %v735_v51 = vadd.f32 1.0, %v3227_v49 }
 0x1f1   : > { %v734_v52 = vadd.f32 1.0, %v3229_v50 }
 0x1f2   : > { %3242 = vrcp.f32 %v735_v51 }
 0x1f3   : > { %v3231_v53 = vpop.eup %3230  ;;  %3244 = vrcp.f32 %v734_v52 }
 0x1f4   : > { %v3233_v54 = vpop.eup %3232  ;;  %v737_v55 = vadd.f32 1.0, %v3231_v53 }
 0x1f5   : > { %v3235_v56 = vpop.eup %3234 }
 0x1f6   : > { %v3237_v57 = vpop.eup %3236  ;;  %v3086_v58 = vpack.c.bf16 %v3233_v54, %v3235_v56  ;;  %3246 = vrcp.f32 %v737_v55 }
 0x1f7   : > { %v736_v59 = vadd.f32 1.0, %v3237_v57 }
 0x1f8   : > { %v3239_v60 = vpop.eup %3238  ;;  %3087 = vmatprep.subr.bf16.mxu1 %v3086_v58 }
 0x1f9   : > { %v3241_v61 = vpop.eup %3240  ;;  %3248 = vrcp.f32 %v736_v59  ;;  %3089 = vmatpush3.bf16.msra.mxu1 %v3086_v58 }
 0x1fa   : > { %v3090_v62 = vpack.c.bf16 %v3239_v60, %v3241_v61 }
 0x1fc   : > { %v3243_v1 = vpop.eup %3242  ;;  %3091 = vmatprep.subr.bf16.mxu1 %v3090_v62 }
 0x1fd   : > { %v3245_v2 = vpop.eup %3244  ;;  %3093 = vmatpush3.bf16.msra.mxu1 %v3090_v62 }
 0x1fe   : > { %v3094_v3 = vpack.c.bf16 %v3243_v1, %v3245_v2 }
 0x200   : > { %3095 = vmatprep.subr.bf16.mxu1 %v3094_v3  ;;  %v3247_v4 = vpop.eup %3246 }
 0x201   : > { %3097 = vmatpush3.bf16.msra.mxu1 %v3094_v3 }
 0x203   : > { %v3249_v5 = vpop.eup %3248 }
 0x204   : > { %v3098_v6 = vpack.c.bf16 %v3247_v4, %v3249_v5 }
 0x206   : > { %3099 = vmatprep.subr.bf16.mxu1 %v3098_v6 }
 0x207   : > { %3101 = vmatpush3.bf16.msra.mxu1 %v3098_v6 }
 0x20a   : > { %2921 = vmatmul.mubr.msk.f32.vlgmr.msra.gmra.mrb[8].mxu1 %vm810_vm2, %v755_v7 }
 0x20b   : > { %2923 = vmatprep.mubr.msk.f32.mxu1 %vm810_vm2, %v756_v8 }
 0x20e   : > { %2924 = vmatmul.mubr.msk.f32.gmra.mrb[10].mxu1 %vm810_vm2, %v757_v9  ;;  %v988_v9 = vld [vmem:[%s4118_s6] sm:$0xff] }
 0x20f   : > { %2926 = vmatprep.mubr.msk.f32.mxu1 %vm810_vm2, %v758_v10 }
 0x212   : > { %2927 = vmatmul.mubr.msk.f32.gmra.mrb[12].mxu1 %vm810_vm2, %v759_v11 }
 0x213   : > { %2929 = vmatprep.mubr.msk.f32.mxu1 %vm810_vm2, %v760_v12 }
 0x216   : > { %2930 = vmatmul.mubr.msk.f32.gmra.mrb[14].mxu1 %vm810_vm2, %v761_v13 }
 0x2dd   : > { %v2922_v19 = vpop.f32.mrb[8].mxu1 }
 0x2de   : > { %v907_v21 = vadd.f32 %v2922_v19, %v778_v16  ;;  %v901_v22 = vpop.f32.mrb[9].mxu1  ;;  %v993_v19 = vpop.permute.xlu0 %992 }
 0x2df   : > { %v902_v23 = vadd.f32 %v901_v22, %v773_v17  ;;  %v1069_v17 = vld [vmem:[%s4120_s8] sm:$0xff] }
 0x2e0   : > { %v2620_v24 = vmul.f32 -1.442695, %v907_v21 }
 0x2e1   : > { %v2619_v25 = vmul.f32 -1.442695, %v902_v23  ;;  %v2925_v26 = vpop.f32.mrb[10].mxu1 }
 0x2e2   : > { %3250 = vpow2.f32 %v2620_v24  ;;  %v917_v27 = vadd.f32 %v2925_v26, %v788_v18  ;;  %v911_v28 = vpop.f32.mrb[11].mxu1  ;;  %v2629_v18 = vld [vmem:[%s4114_s2 + $0x40] sm:$0xff] }
 0x2e3   : > { %3252 = vpow2.f32 %v2619_v25  ;;  %v912_v30 = vadd.f32 %v911_v28, %v783_v20 }
 0x2e4   : > { %v2622_v32 = vmul.f32 -1.442695, %v917_v27  ;;  %v1074_v27 = vpop.permute.xlu1 %1073 }
 0x2e5   : > { %v2621_v33 = vmul.f32 -1.442695, %v912_v30  ;;  %v2928_v34 = vpop.f32.mrb[12].mxu1 }
 0x2e6   : > { %3254 = vpow2.f32 %v2622_v32  ;;  %v927_v35 = vadd.f32 %v2928_v34, %v798_v29  ;;  %v921_v36 = vpop.f32.mrb[13].mxu1  ;;  %v2631_v32 = vld [vmem:[%s4114_s2 + $0x50] sm:$0xff]  ;;  %v2634_v34 = vld [vmem:[%s4114_s2 + $0x68] sm:$0xff] }
 0x2e7   : > { %3256 = vpow2.f32 %v2621_v33  ;;  %v922_v37 = vadd.f32 %v921_v36, %v793_v31  ;;  %v2630_v31 = vld [vmem:[%s4114_s2 + $0x48] sm:$0xff]  ;;  %v2633_v33 = vld [vmem:[%s4114_s2 + $0x60] sm:$0xff]  ;;  %v2636_v36 = vld [vmem:[%s4114_s2 + $0x78] sm:$0xff] }
 0x2e8   : > { %v2624_v38 = vmul.f32 -1.442695, %v927_v35  ;;  %v2635_v35 = vld [vmem:[%s4114_s2 + $0x70] sm:$0xff] }
 0x2e9   : > { %v2623_v40 = vmul.f32 -1.442695, %v922_v37  ;;  %v2931_v41 = vpop.f32.mrb[14].mxu1  ;;  %v2661_v37 = vld [vmem:[%s4116_s4 + $0x40] sm:$0xff] }
 0x2ea   : > { %3258 = vpow2.f32 %v2624_v38  ;;  %v937_v43 = vadd.f32 %v2931_v41, %v808_v39  ;;  %v931_v44 = vpop.f32.mrb[15].mxu1  ;;  %2984 = vmatprep.mubr.msk.f32.mxu1 %vm810_vm2, %v2661_v37  ;;  %v1186_v38 = vpop.permute.xlu1 %1185 }
 0x2eb   : > { %3260 = vpow2.f32 %v2623_v40  ;;  %v932_v45 = vadd.f32 %v931_v44, %v803_v42  ;;  %v1181_v39 = vpop.permute.xlu0 %1180 }
 0x2ec   : > { %v3251_v46 = vpop.eup %3250  ;;  %v2626_v47 = vmul.f32 -1.442695, %v937_v43 }
 0x2ed   : > { %v3253_v48 = vpop.eup %3252  ;;  %v965_v49 = vadd.f32 1.0, %v3251_v46  ;;  %v2625_v50 = vmul.f32 -1.442695, %v932_v45 }
 0x2ee   : > { %v964_v51 = vadd.f32 1.0, %v3253_v48  ;;  %3262 = vpow2.f32 %v2626_v47  ;;  %v1196_v40 = vpop.permute.xlu1 %1195 }
 0x2ef   : > { %3264 = vrcp.f32 %v965_v49  ;;  %v1191_v42 = vpop.permute.xlu0 %1190 }
 0x2f0   : > { %v3255_v52 = vpop.eup %3254  ;;  %3266 = vrcp.f32 %v964_v51 }
 0x2f1   : > { %v3257_v53 = vpop.eup %3256  ;;  %v967_v54 = vadd.f32 1.0, %v3255_v52  ;;  %3268 = vpow2.f32 %v2625_v50 }
 0x2f2   : > { %v966_v55 = vadd.f32 1.0, %v3257_v53  ;;  %v1206_v51 = vpop.permute.xlu1 %1205 }
 0x2f3   : > { %3270 = vrcp.f32 %v967_v54  ;;  %v1201_v53 = vpop.permute.xlu0 %1200 }
 0x2f4   : > { %v3259_v56 = vpop.eup %3258  ;;  %3272 = vrcp.f32 %v966_v55 }
 0x2f5   : > { %v3261_v57 = vpop.eup %3260  ;;  %v969_v58 = vadd.f32 1.0, %v3259_v56 }
 0x2f6   : > { %v968_v59 = vadd.f32 1.0, %v3261_v57 }
 0x2f7   : > { %3274 = vrcp.f32 %v969_v58 }
 0x2f8   : > { %v3263_v60 = vpop.eup %3262  ;;  %3276 = vrcp.f32 %v968_v59 }
 0x2f9   : > { %v3265_v61 = vpop.eup %3264  ;;  %v971_v62 = vadd.f32 1.0, %v3263_v60 }
 0x2fa   : > { %v3267_v1 = vpop.eup %3266 }
 0x2fb   : > { %v3269_v2 = vpop.eup %3268  ;;  %v3103_v3 = vpack.c.bf16 %v3265_v61, %v3267_v1  ;;  %3278 = vrcp.f32 %v971_v62  ;;  %v1216_v61 = vpop.permute.xlu1 %1215 }
 0x2fc   : > { %v970_v4 = vadd.f32 1.0, %v3269_v2  ;;  %v1211_v2 = vpop.permute.xlu0 %1210 }
 0x2fd   : > { %v3271_v5 = vpop.eup %3270  ;;  %3104 = vmatpush3.bf16.msra.mxu0 %v3103_v3 }
 0x2fe   : > { %v3273_v6 = vpop.eup %3272  ;;  %3280 = vrcp.f32 %v970_v4  ;;  %3105 = vmatprep.subr.bf16.mxu0 %v3481_v14 }
 0x2ff   : > { %v3106_v7 = vpack.c.bf16 %v3271_v5, %v3273_v6 }
 0x301   : > { %v3275_v8 = vpop.eup %3274  ;;  %3107 = vmatpush3.bf16.msra.mxu0 %v3106_v7 }
 0x302   : > { %v3277_v10 = vpop.eup %3276  ;;  %3108 = vmatprep.subr.bf16.mxu0 %v3481_v14 }
 0x303   : > { %v3109_v11 = vpack.c.bf16 %v3275_v8, %v3277_v10 }
 0x304   : > { %2941 = vmatmul.mubr.msk.f32.vlgmr.msra.gmra.mrb[2].mxu0 %vm995_vm4, %v988_v9 }
 0x305   : > { %3110 = vmatpush3.bf16.msra.mxu0 %v3109_v11  ;;  %2951 = vmatprep.mubr.msk.f32.mxu0 %vm3482_vm3, %v3483_v15  ;;  %v3279_v12 = vpop.eup %3278 }
 0x306   : > { %3111 = vmatprep.subr.bf16.mxu0 %v3481_v14 }
 0x308   : > { %v3281_v13 = vpop.eup %3280 }
 0x309   : > { %v3112_v16 = vpack.c.bf16 %v3279_v12, %v3281_v13 }
 0x30b   : > { %3113 = vmatpush3.bf16.msra.mxu0 %v3112_v16 }
 0x30e   : > { %2952 = vmatmul.mubr.msk.f32.vlgmr.msra.gmra.mrb[4].mxu0 %vm995_vm4, %v1069_v17 }
 0x30f   : > { %2956 = vmatprep.mubr.msk.f32.mxu0 %vm576_vm1, %v2629_v18 }
 0x3d7   : > { %v1065_v20 = vpop.f32.mrb[2].mxu0 }
 0x3d8   : > { %v3871_v21 = vadd.f32 %v1065_v20, %v993_v19  ;;  %v2942_v22 = vpop.f32.mrb[3].mxu0 }
 0x3da   : > { %v1149_v23 = vmul.f32 1.442695, %v3871_v21 }
 0x3dc   : > { %3282 = vpow2.f32 %v1149_v23 }
 0x3e1   : > { %v1145_v24 = vpop.f32.mrb[4].mxu0 }
 0x3e2   : > { %v2953_v25 = vpop.f32.mrb[5].mxu0  ;;  %v1146_v28 = vadd.f32 %v1145_v24, %v1074_v27 }
 0x3e6   : > { %v3283_v26 = vpop.eup %3282 }
 0x3e7   : > { %v1151_v29 = vmul.f32 %v3283_v26, %v3785_v63  ;;  %v2632_v63 = vld [vmem:[%s4114_s2 + $0x58] sm:$0xff] }
 0x3e9   : > { %v3875_v30 = vadd.f32 %v1151_v29, %v1146_v28 }
 0x3eb   : > { %2954 = vmatprep.subr.mxu0 %v3875_v30 }
 0x3ec   : > { %2955 = vmatpush3.msra.mxu0 %v3875_v30 }
 0x3ed   : > { %2957 = vmatmul.mubr.msk.f32.vlgmr.msra.gmra.mrb[6].mxu0 %vm576_vm1, %v2630_v31  ;;  %3130 = vmatprep.subr.bf16.mxu0 %v3481_v14 }
 0x3ee   : > { %2959 = vmatprep.mubr.msk.f32.mxu0 %vm576_vm1, %v2631_v32 }
 0x3f1   : > { %2960 = vmatmul.mubr.msk.f32.gmra.mrb[8].mxu0 %vm576_vm1, %v2632_v63 }
 0x3f2   : > { %2962 = vmatprep.mubr.msk.f32.mxu0 %vm576_vm1, %v2633_v33 }
 0x3f5   : > { %2963 = vmatmul.mubr.msk.f32.gmra.mrb[10].mxu0 %vm576_vm1, %v2634_v34 }
 0x3f6   : > { %2965 = vmatprep.mubr.msk.f32.mxu0 %vm576_vm1, %v2635_v35 }
 0x3f9   : > { %2966 = vmatmul.mubr.msk.f32.gmra.mrb[12].mxu0 %vm576_vm1, %v2636_v36 }
 0x3fa   : > { %3004 = vmatprep.mubr.msk.f32.mxu0 %vm3482_vm3, %v3483_v15 }
 0x4c0   : > { %v2958_v41 = vpop.f32.mrb[6].mxu0 }
 0x4c1   : > { %v1314_v43 = vadd.f32 %v2958_v41, %v1186_v38  ;;  %v1308_v44 = vpop.f32.mrb[7].mxu0  ;;  %v2664_v41 = vld [vmem:[%s4116_s4 + $0x58] sm:$0xff] }
 0x4c2   : > { %v1309_v45 = vadd.f32 %v1308_v44, %v1181_v39  ;;  %v2662_v39 = vld [vmem:[%s4116_s4 + $0x48] sm:$0xff]  ;;  %v2667_v44 = vld [vmem:[%s4116_s4 + $0x70] sm:$0xff] }
 0x4c3   : > { %v2654_v46 = vmul.f32 -1.442695, %v1314_v43  ;;  %v2666_v43 = vld [vmem:[%s4116_s4 + $0x68] sm:$0xff] }
 0x4c4   : > { %v2653_v47 = vmul.f32 -1.442695, %v1309_v45  ;;  %v2961_v48 = vpop.f32.mrb[8].mxu0  ;;  %v2668_v45 = vld [vmem:[%s4116_s4 + $0x78] sm:$0xff] }
 0x4c5   : > { %3284 = vpow2.f32 %v2654_v46  ;;  %v1324_v49 = vadd.f32 %v2961_v48, %v1196_v40  ;;  %v1318_v50 = vpop.f32.mrb[9].mxu0  ;;  %v2663_v40 = vld [vmem:[%s4116_s4 + $0x50] sm:$0xff]  ;;  %v1421_v46 = vpop.permute.xlu1 %1420 }
 0x4c6   : > { %3286 = vpow2.f32 %v2653_v47  ;;  %v1319_v52 = vadd.f32 %v1318_v50, %v1191_v42  ;;  %v2665_v42 = vld [vmem:[%s4116_s4 + $0x60] sm:$0xff]  ;;  %v1416_v47 = vpop.permute.xlu0 %1415 }
 0x4c7   : > { %v2656_v54 = vmul.f32 -1.442695, %v1324_v49 }
 0x4c8   : > { %v2655_v55 = vmul.f32 -1.442695, %v1319_v52  ;;  %v2964_v56 = vpop.f32.mrb[10].mxu0 }
 0x4c9   : > { %3288 = vpow2.f32 %v2656_v54  ;;  %v1334_v57 = vadd.f32 %v2964_v56, %v1206_v51  ;;  %v1328_v58 = vpop.f32.mrb[11].mxu0  ;;  %v1431_v48 = vpop.permute.xlu1 %1430 }
 0x4ca   : > { %3290 = vpow2.f32 %v2655_v55  ;;  %v1329_v59 = vadd.f32 %v1328_v58, %v1201_v53  ;;  %v1426_v50 = vpop.permute.xlu0 %1425 }
 0x4cb   : > { %v2658_v60 = vmul.f32 -1.442695, %v1334_v57 }
 0x4cc   : > { %v2657_v62 = vmul.f32 -1.442695, %v1329_v59  ;;  %v2967_v1 = vpop.f32.mrb[12].mxu0 }
 0x4cd   : > { %3292 = vpow2.f32 %v2658_v60  ;;  %v1344_v3 = vadd.f32 %v2967_v1, %v1216_v61  ;;  %v1338_v4 = vpop.f32.mrb[13].mxu0  ;;  %v1441_v59 = vpop.permute.xlu1 %1440 }
 0x4ce   : > { %3294 = vpow2.f32 %v2657_v62  ;;  %v1339_v5 = vadd.f32 %v1338_v4, %v1211_v2  ;;  %v1436_v61 = vpop.permute.xlu0 %1435 }
 0x4cf   : > { %v3285_v6 = vpop.eup %3284  ;;  %v2660_v7 = vmul.f32 -1.442695, %v1344_v3 }
 0x4d0   : > { %v3287_v8 = vpop.eup %3286  ;;  %v1372_v9 = vadd.f32 1.0, %v3285_v6  ;;  %v2659_v10 = vmul.f32 -1.442695, %v1339_v5 }
 0x4d1   : > { %v1371_v11 = vadd.f32 1.0, %v3287_v8  ;;  %3296 = vpow2.f32 %v2660_v7  ;;  %v1451_v7 = vpop.permute.xlu1 %1450 }
 0x4d2   : > { %3298 = vrcp.f32 %v1372_v9 }
 0x4d3   : > { %v3289_v12 = vpop.eup %3288  ;;  %3300 = vrcp.f32 %v1371_v11 }
 0x4d4   : > { %v3291_v13 = vpop.eup %3290  ;;  %v1374_v16 = vadd.f32 1.0, %v3289_v12  ;;  %3302 = vpow2.f32 %v2659_v10  ;;  %v1446_v10 = vpop.permute.xlu0 %1445 }
 0x4d5   : > { %v1373_v17 = vadd.f32 1.0, %v3291_v13 }
 0x4d6   : > { %3304 = vrcp.f32 %v1374_v16 }
 0x4d7   : > { %v3293_v18 = vpop.eup %3292  ;;  %3306 = vrcp.f32 %v1373_v17 }
 0x4d8   : > { %v3295_v19 = vpop.eup %3294  ;;  %v1376_v20 = vadd.f32 1.0, %v3293_v18 }
 0x4d9   : > { %v1375_v22 = vadd.f32 1.0, %v3295_v19 }
 0x4da   : > { %3308 = vrcp.f32 %v1376_v20 }
 0x4db   : > { %v3297_v23 = vpop.eup %3296  ;;  %3310 = vrcp.f32 %v1375_v22 }
 0x4dc   : > { %v3299_v24 = vpop.eup %3298  ;;  %v1378_v25 = vadd.f32 1.0, %v3297_v23 }
 0x4dd   : > { %v3301_v26 = vpop.eup %3300 }
 0x4de   : > { %v3303_v27 = vpop.eup %3302  ;;  %v3114_v28 = vpack.c.bf16 %v3299_v24, %v3301_v26  ;;  %3312 = vrcp.f32 %v1378_v25 }
 0x4df   : > { %v1377_v29 = vadd.f32 1.0, %v3303_v27 }
 0x4e0   : > { %v3305_v31 = vpop.eup %3304  ;;  %3115 = vmatprep.subr.bf16.mxu1 %v3114_v28 }
 0x4e1   : > { %v3307_v32 = vpop.eup %3306  ;;  %3314 = vrcp.f32 %v1377_v29  ;;  %3117 = vmatpush3.bf16.msra.mxu1 %v3114_v28 }
 0x4e2   : > { %v3118_v63 = vpack.c.bf16 %v3305_v31, %v3307_v32 }
 0x4e4   : > { %v3309_v33 = vpop.eup %3308  ;;  %3119 = vmatprep.subr.bf16.mxu1 %v3118_v63 }
 0x4e5   : > { %v3311_v34 = vpop.eup %3310  ;;  %3121 = vmatpush3.bf16.msra.mxu1 %v3118_v63 }
 0x4e6   : > { %v3122_v35 = vpack.c.bf16 %v3309_v33, %v3311_v34 }
 0x4e8   : > { %3123 = vmatprep.subr.bf16.mxu1 %v3122_v35  ;;  %v3313_v36 = vpop.eup %3312 }
 0x4e9   : > { %3125 = vmatpush3.bf16.msra.mxu1 %v3122_v35 }
 0x4eb   : > { %v3315_v37 = vpop.eup %3314 }
 0x4ec   : > { %v3126_v38 = vpack.c.bf16 %v3313_v36, %v3315_v37 }
 0x4ee   : > { %3127 = vmatprep.subr.bf16.mxu1 %v3126_v38 }
 0x4ef   : > { %3129 = vmatpush3.bf16.msra.mxu1 %v3126_v38 }
 0x4f2   : > { %2985 = vmatmul.mubr.msk.f32.vlgmr.msra.gmra.mrb[16].mxu1 %vm810_vm2, %v2662_v39 }
 0x4f3   : > { %2987 = vmatprep.mubr.msk.f32.mxu1 %vm810_vm2, %v2663_v40 }
 0x4f6   : > { %2988 = vmatmul.mubr.msk.f32.gmra.mrb[18].mxu1 %vm810_vm2, %v2664_v41 }
 0x4f7   : > { %2990 = vmatprep.mubr.msk.f32.mxu1 %vm810_vm2, %v2665_v42  ;;  %v2693_v42 = vld [vmem:[%s4118_s6 + $0x8] sm:$0xff] }
 0x4fa   : > { %2991 = vmatmul.mubr.msk.f32.gmra.mrb[20].mxu1 %vm810_vm2, %v2666_v43 }
 0x4fb   : > { %2993 = vmatprep.mubr.msk.f32.mxu1 %vm810_vm2, %v2667_v44 }
 0x4fe   : > { %2994 = vmatmul.mubr.msk.f32.gmra.mrb[22].mxu1 %vm810_vm2, %v2668_v45 }
 0x5c5   : > { %v2986_v49 = vpop.f32.mrb[16].mxu1 }
 0x5c6   : > { %v1549_v51 = vadd.f32 %v2986_v49, %v1421_v46  ;;  %v1543_v52 = vpop.f32.mrb[17].mxu1  ;;  %v2699_v49 = vld [vmem:[%s4114_s2 + $0x80] sm:$0xff] }
 0x5c7   : > { %v1544_v53 = vadd.f32 %v1543_v52, %v1416_v47  ;;  %3020 = vmatprep.mubr.msk.f32.mxu1 %vm576_vm1, %v2699_v49  ;;  %v1637_v52 = vpop.permute.xlu0 %1636 }
 0x5c8   : > { %v2686_v54 = vmul.f32 -1.442695, %v1549_v51 }
 0x5c9   : > { %v2685_v55 = vmul.f32 -1.442695, %v1544_v53  ;;  %v2989_v56 = vpop.f32.mrb[18].mxu1 }
 0x5ca   : > { %3316 = vpow2.f32 %v2686_v54  ;;  %v1559_v57 = vadd.f32 %v2989_v56, %v1431_v48  ;;  %v1553_v58 = vpop.f32.mrb[19].mxu1  ;;  %v2696_v48 = vld [vmem:[%s4120_s8 + $0x8] sm:$0xff] }
 0x5cb   : > { %3318 = vpow2.f32 %v2685_v55  ;;  %v1554_v60 = vadd.f32 %v1553_v58, %v1426_v50  ;;  %v1153_v50 = vrot.slane %v3871_v21, 4 }
 0x5cc   : > { %v2688_v62 = vmul.f32 -1.442695, %v1559_v57 }
 0x5cd   : > { %v2687_v1 = vmul.f32 -1.442695, %v1554_v60  ;;  %v2992_v2 = vpop.f32.mrb[20].mxu1  ;;  %v1154_v51 = vadd.f32 %v1153_v50, %v3871_v21 }
 0x5ce   : > { %3320 = vpow2.f32 %v2688_v62  ;;  %v1569_v3 = vadd.f32 %v2992_v2, %v1441_v59  ;;  %v1563_v4 = vpop.f32.mrb[21].mxu1 }
 0x5cf   : > { %3322 = vpow2.f32 %v2687_v1  ;;  %v1564_v5 = vadd.f32 %v1563_v4, %v1436_v61  ;;  %v1155_v54 = vrot.slane %v1154_v51, 2 }
 0x5d0   : > { %v2690_v6 = vmul.f32 -1.442695, %v1569_v3 }
 0x5d1   : > { %v2689_v8 = vmul.f32 -1.442695, %v1564_v5  ;;  %v2995_v9 = vpop.f32.mrb[22].mxu1  ;;  %v1156_v59 = vadd.f32 %v1155_v54, %v1154_v51 }
 0x5d2   : > { %3324 = vpow2.f32 %v2690_v6  ;;  %v1579_v11 = vadd.f32 %v2995_v9, %v1451_v7  ;;  %v1573_v12 = vpop.f32.mrb[23].mxu1  ;;  %v1719_v7 = vpop.permute.xlu1 %1718 }
 0x5d3   : > { %3326 = vpow2.f32 %v2689_v8  ;;  %v1574_v13 = vadd.f32 %v1573_v12, %v1446_v10  ;;  %v1157_v62 = vrot.slane %v1156_v59, 1  ;;  %v2700_v12 = vld [vmem:[%s4114_s2 + $0x88] sm:$0xff] }
 0x5d4   : > { %v3317_v16 = vpop.eup %3316  ;;  %v2692_v17 = vmul.f32 -1.442695, %v1579_v11 }
 0x5d5   : > { %v3319_v18 = vpop.eup %3318  ;;  %v1607_v19 = vadd.f32 1.0, %v3317_v16  ;;  %v2691_v20 = vmul.f32 -1.442695, %v1574_v13  ;;  %v1158_v5 = vadd.f32 %v1157_v62, %v1156_v59  ;;  %v2701_v13 = vld [vmem:[%s4114_s2 + $0x90] sm:$0xff]  ;;  %v2703_v16 = vld [vmem:[%s4114_s2 + $0xa0] sm:$0xff] }
 0x5d6   : > { %v1606_v22 = vadd.f32 1.0, %v3319_v18  ;;  %3328 = vpow2.f32 %v2692_v17  ;;  %v2704_v17 = vld [vmem:[%s4114_s2 + $0xa8] sm:$0xff]  ;;  %v2705_v18 = vld [vmem:[%s4114_s2 + $0xb0] sm:$0xff] }
 0x5d7   : > { %3330 = vrcp.f32 %v1607_v19  ;;  %v2706_v19 = vld [vmem:[%s4114_s2 + $0xb8] sm:$0xff] }
 0x5d8   : > { %v3321_v23 = vpop.eup %3320  ;;  %3332 = vrcp.f32 %v1606_v22  ;;  %v1831_v22 = vpop.permute.xlu1 %1830 }
 0x5d9   : > { %v3323_v24 = vpop.eup %3322  ;;  %v1609_v25 = vadd.f32 1.0, %v3321_v23  ;;  %3334 = vpow2.f32 %v2691_v20  ;;  %v2731_v20 = vld [vmem:[%s4116_s4 + $0x80] sm:$0xff]  ;;  %v1826_v23 = vpop.permute.xlu0 %1825 }
 0x5da   : > { %v1608_v26 = vadd.f32 1.0, %v3323_v24 }
 0x5db   : > { %3336 = vrcp.f32 %v1609_v25 }
 0x5dc   : > { %v3325_v27 = vpop.eup %3324  ;;  %3338 = vrcp.f32 %v1608_v26  ;;  %v1841_v24 = vpop.permute.xlu1 %1840 }
 0x5dd   : > { %v3327_v28 = vpop.eup %3326  ;;  %v1611_v29 = vadd.f32 1.0, %v3325_v27  ;;  %v1836_v26 = vpop.permute.xlu0 %1835 }
 0x5de   : > { %v1610_v31 = vadd.f32 1.0, %v3327_v28 }
 0x5df   : > { %3340 = vrcp.f32 %v1611_v29 }
 0x5e0   : > { %v3329_v32 = vpop.eup %3328  ;;  %3342 = vrcp.f32 %v1610_v31 }
 0x5e1   : > { %v3331_v63 = vpop.eup %3330  ;;  %v1613_v33 = vadd.f32 1.0, %v3329_v32 }
 0x5e2   : > { %v3333_v34 = vpop.eup %3332 }
 0x5e3   : > { %v3335_v35 = vpop.eup %3334  ;;  %v3131_v36 = vpack.c.bf16 %v3331_v63, %v3333_v34  ;;  %3344 = vrcp.f32 %v1613_v33 }
 0x5e4   : > { %v1612_v37 = vadd.f32 1.0, %v3335_v35  ;;  %v1851_v35 = vpop.permute.xlu1 %1850 }
 0x5e5   : > { %v3337_v38 = vpop.eup %3336  ;;  %3132 = vmatpush3.bf16.msra.mxu0 %v3131_v36 }
 0x5e6   : > { %v3339_v39 = vpop.eup %3338  ;;  %3346 = vrcp.f32 %v1612_v37  ;;  %3133 = vmatprep.subr.bf16.mxu0 %v3481_v14  ;;  %v1846_v37 = vpop.permute.xlu0 %1845 }
 0x5e7   : > { %v3134_v40 = vpack.c.bf16 %v3337_v38, %v3339_v39 }
 0x5e9   : > { %v3341_v41 = vpop.eup %3340  ;;  %3135 = vmatpush3.bf16.msra.mxu0 %v3134_v40 }
 0x5ea   : > { %v3343_v43 = vpop.eup %3342  ;;  %3136 = vmatprep.subr.bf16.mxu0 %v3481_v14 }
 0x5eb   : > { %v3137_v44 = vpack.c.bf16 %v3341_v41, %v3343_v43 }
 0x5ec   : > { %3005 = vmatmul.mubr.msk.f32.vlgmr.msra.gmra.mrb[14].mxu0 %vm995_vm4, %v2693_v42 }
 0x5ed   : > { %3138 = vmatpush3.bf16.msra.mxu0 %v3137_v44  ;;  %3015 = vmatprep.mubr.msk.f32.mxu0 %vm3482_vm3, %v3483_v15  ;;  %v3345_v45 = vpop.eup %3344 }
 0x5ee   : > { %3139 = vmatprep.subr.bf16.mxu0 %v3481_v14 }
 0x5f0   : > { %v3347_v46 = vpop.eup %3346 }
 0x5f1   : > { %v3140_v47 = vpack.c.bf16 %v3345_v45, %v3347_v46  ;;  %v1861_v45 = vpop.permute.xlu1 %1860 }
 0x5f3   : > { %3141 = vmatpush3.bf16.msra.mxu0 %v3140_v47 }
 0x5f6   : > { %3016 = vmatmul.mubr.msk.f32.vlgmr.msra.gmra.mrb[16].mxu0 %vm995_vm4, %v2696_v48  ;;  %v1856_v48 = vpop.permute.xlu0 %1855 }
 0x5f7   : > { %3048 = vmatprep.mubr.msk.f32.mxu0 %vm810_vm2, %v2731_v20 }
 0x6bf   : > { %v1708_v53 = vpop.f32.mrb[14].mxu0 }
 0x6c0   : > { %v1709_v55 = vadd.f32 %v1708_v53, %v1637_v52  ;;  %v3006_v56 = vpop.f32.mrb[15].mxu0 }
 0x6c2   : > { %v1794_v57 = vmul.f32 1.442695, %v1709_v55  ;;  %v1798_v58 = vrot.slane %v1709_v55, 4 }
 0x6c4   : > { %3348 = vpow2.f32 %v1794_v57  ;;  %v1799_v60 = vadd.f32 %v1798_v58, %v1709_v55 }
 0x6c6   : > { %v1800_v61 = vrot.slane %v1799_v60, 2 }
 0x6c8   : > { %v1801_v1 = vadd.f32 %v1800_v61, %v1799_v60 }
 0x6c9   : > { %v1790_v2 = vpop.f32.mrb[16].mxu0 }
 0x6ca   : > { %v1802_v3 = vrot.slane %v1801_v1, 1  ;;  %v3017_v4 = vpop.f32.mrb[17].mxu0  ;;  %v1791_v9 = vadd.f32 %v1790_v2, %v1719_v7 }
 0x6cc   : > { %v1803_v6 = vadd.f32 %v1802_v3, %v1801_v1 }
 0x6ce   : > { %v3349_v21 = vpop.eup %3348  ;;  %v3961_v8 = vadd.f32 %v1803_v6, %v1158_v5 }
 0x6cf   : > { %v1796_v10 = vmul.f32 %v3349_v21, %v3787_v0  ;;  %v2702_v0 = vld [vmem:[%s4114_s2 + $0x98] sm:$0xff] }
 0x6d1   : > { %v3964_v11 = vadd.f32 %v1796_v10, %v1791_v9 }
 0x6d3   : > { %2450 = vst [vmem:[%s3970_s29] sm:$0xff] %v3964_v11  ;;  %3018 = vmatprep.subr.mxu1 %v3964_v11 }
 0x6d4   : > { %3019 = vmatpush3.msra.mxu1 %v3964_v11 }
 0x6d5   : > { %3021 = vmatmul.mubr.msk.f32.vlgmr.msra.gmra.mrb[24].mxu1 %vm576_vm1, %v2700_v12  ;;  %3158 = vmatprep.subr.bf16.mxu1 %v3481_v14 }
 0x6d6   : > { %3023 = vmatprep.mubr.msk.f32.mxu1 %vm576_vm1, %v2701_v13 }
 0x6d9   : > { %3024 = vmatmul.mubr.msk.f32.gmra.mrb[26].mxu1 %vm576_vm1, %v2702_v0 }
 0x6da   : > { %3026 = vmatprep.mubr.msk.f32.mxu1 %vm576_vm1, %v2703_v16 }
 0x6dd   : > { %3027 = vmatmul.mubr.msk.f32.gmra.mrb[28].mxu1 %vm576_vm1, %v2704_v17 }
 0x6de   : > { %3029 = vmatprep.mubr.msk.f32.mxu1 %vm576_vm1, %v2705_v18 }
 0x6e1   : > { %3030 = vmatmul.mubr.msk.f32.gmra.mrb[30].mxu1 %vm576_vm1, %v2706_v19 }
 0x6e2   : > { %3068 = vmatprep.mubr.msk.f32.mxu1 %vm3482_vm3, %v3483_v15 }
 0x7a8   : > { %v3022_v25 = vpop.f32.mrb[24].mxu1 }
 0x7a9   : > { %v1959_v27 = vadd.f32 %v3022_v25, %v1831_v22  ;;  %v1953_v28 = vpop.f32.mrb[25].mxu1  ;;  %v2734_v25 = vld [vmem:[%s4116_s4 + $0x98] sm:$0xff] }
 0x7aa   : > { %v1954_v29 = vadd.f32 %v1953_v28, %v1826_v23  ;;  %v2732_v23 = vld [vmem:[%s4116_s4 + $0x88] sm:$0xff]  ;;  %v2737_v28 = vld [vmem:[%s4116_s4 + $0xb0] sm:$0xff] }
 0x7ab   : > { %v2724_v31 = vmul.f32 -1.442695, %v1959_v27  ;;  %v2736_v27 = vld [vmem:[%s4116_s4 + $0xa8] sm:$0xff] }
 0x7ac   : > { %v2723_v32 = vmul.f32 -1.442695, %v1954_v29  ;;  %v3025_v63 = vpop.f32.mrb[26].mxu1  ;;  %v2738_v29 = vld [vmem:[%s4116_s4 + $0xb8] sm:$0xff] }
 0x7ad   : > { %3350 = vpow2.f32 %v2724_v31  ;;  %v1969_v33 = vadd.f32 %v3025_v63, %v1841_v24  ;;  %v1963_v34 = vpop.f32.mrb[27].mxu1  ;;  %v2733_v24 = vld [vmem:[%s4116_s4 + $0x90] sm:$0xff]  ;;  %v2066_v31 = vpop.permute.xlu1 %2065 }
 0x7ae   : > { %3352 = vpow2.f32 %v2723_v32  ;;  %v1964_v36 = vadd.f32 %v1963_v34, %v1836_v26  ;;  %v2735_v26 = vld [vmem:[%s4116_s4 + $0xa0] sm:$0xff]  ;;  %v2061_v32 = vpop.permute.xlu0 %2060 }
 0x7af   : > { %v2726_v38 = vmul.f32 -1.442695, %v1969_v33 }
 0x7b0   : > { %v2725_v39 = vmul.f32 -1.442695, %v1964_v36  ;;  %v3028_v40 = vpop.f32.mrb[28].mxu1 }
 0x7b1   : > { %3354 = vpow2.f32 %v2726_v38  ;;  %v1979_v41 = vadd.f32 %v3028_v40, %v1851_v35  ;;  %v1973_v42 = vpop.f32.mrb[29].mxu1  ;;  %v2076_v63 = vpop.permute.xlu1 %2075 }
 0x7b2   : > { %3356 = vpow2.f32 %v2725_v39  ;;  %v1974_v43 = vadd.f32 %v1973_v42, %v1846_v37  ;;  %v2071_v34 = vpop.permute.xlu0 %2070 }
 0x7b3   : > { %v2728_v44 = vmul.f32 -1.442695, %v1979_v41 }
 0x7b4   : > { %v2727_v46 = vmul.f32 -1.442695, %v1974_v43  ;;  %v3031_v47 = vpop.f32.mrb[30].mxu1 }
 0x7b5   : > { %3358 = vpow2.f32 %v2728_v44  ;;  %v1989_v49 = vadd.f32 %v3031_v47, %v1861_v45  ;;  %v1983_v50 = vpop.f32.mrb[31].mxu1  ;;  %v2086_v43 = vpop.permute.xlu1 %2085 }
 0x7b6   : > { %3360 = vpow2.f32 %v2727_v46  ;;  %v1984_v51 = vadd.f32 %v1983_v50, %v1856_v48  ;;  %v2081_v45 = vpop.permute.xlu0 %2080 }
 0x7b7   : > { %v3351_v52 = vpop.eup %3350  ;;  %v2730_v53 = vmul.f32 -1.442695, %v1989_v49 }
 0x7b8   : > { %v3353_v54 = vpop.eup %3352  ;;  %v2017_v55 = vadd.f32 1.0, %v3351_v52  ;;  %v2729_v56 = vmul.f32 -1.442695, %v1984_v51 }
 0x7b9   : > { %v2016_v57 = vadd.f32 1.0, %v3353_v54  ;;  %3362 = vpow2.f32 %v2730_v53  ;;  %v2096_v53 = vpop.permute.xlu1 %2095 }
 0x7ba   : > { %3364 = vrcp.f32 %v2017_v55 }
 0x7bb   : > { %v3355_v58 = vpop.eup %3354  ;;  %3366 = vrcp.f32 %v2016_v57 }
 0x7bc   : > { %v3357_v59 = vpop.eup %3356  ;;  %v2019_v60 = vadd.f32 1.0, %v3355_v58  ;;  %3368 = vpow2.f32 %v2729_v56  ;;  %v2091_v56 = vpop.permute.xlu0 %2090 }
 0x7bd   : > { %v2018_v61 = vadd.f32 1.0, %v3357_v59 }
 0x7be   : > { %3370 = vrcp.f32 %v2019_v60 }
 0x7bf   : > { %v3359_v62 = vpop.eup %3358  ;;  %3372 = vrcp.f32 %v2018_v61 }
 0x7c0   : > { %v3361_v1 = vpop.eup %3360  ;;  %v2021_v2 = vadd.f32 1.0, %v3359_v62 }
 0x7c1   : > { %v2020_v3 = vadd.f32 1.0, %v3361_v1 }
 0x7c2   : > { %3374 = vrcp.f32 %v2021_v2 }
 0x7c3   : > { %v3363_v4 = vpop.eup %3362  ;;  %3376 = vrcp.f32 %v2020_v3 }
 0x7c4   : > { %v3365_v5 = vpop.eup %3364  ;;  %v2023_v6 = vadd.f32 1.0, %v3363_v4 }
 0x7c5   : > { %v3367_v21 = vpop.eup %3366 }
 0x7c6   : > { %v3369_v7 = vpop.eup %3368  ;;  %v3142_v9 = vpack.c.bf16 %v3365_v5, %v3367_v21  ;;  %3378 = vrcp.f32 %v2023_v6 }
 0x7c7   : > { %v2022_v10 = vadd.f32 1.0, %v3369_v7 }
 0x7c8   : > { %v3371_v12 = vpop.eup %3370  ;;  %3143 = vmatprep.subr.bf16.mxu0 %v3142_v9 }
 0x7c9   : > { %v3373_v13 = vpop.eup %3372  ;;  %3380 = vrcp.f32 %v2022_v10  ;;  %3145 = vmatpush3.bf16.msra.mxu0 %v3142_v9 }
 0x7ca   : > { %v3146_v0 = vpack.c.bf16 %v3371_v12, %v3373_v13 }
 0x7cc   : > { %v3375_v16 = vpop.eup %3374  ;;  %3147 = vmatprep.subr.bf16.mxu0 %v3146_v0 }
 0x7cd   : > { %v3377_v17 = vpop.eup %3376  ;;  %3149 = vmatpush3.bf16.msra.mxu0 %v3146_v0 }
 0x7ce   : > { %v3150_v18 = vpack.c.bf16 %v3375_v16, %v3377_v17 }
 0x7d0   : > { %3151 = vmatprep.subr.bf16.mxu0 %v3150_v18  ;;  %v3379_v19 = vpop.eup %3378 }
 0x7d1   : > { %3153 = vmatpush3.bf16.msra.mxu0 %v3150_v18 }
 0x7d3   : > { %v3381_v20 = vpop.eup %3380 }
 0x7d4   : > { %v3154_v22 = vpack.c.bf16 %v3379_v19, %v3381_v20 }
 0x7d6   : > { %3155 = vmatprep.subr.bf16.mxu0 %v3154_v22 }
 0x7d7   : > { %3157 = vmatpush3.bf16.msra.mxu0 %v3154_v22 }
 0x7da   : > { %3049 = vmatmul.mubr.msk.f32.vlgmr.msra.gmra.mrb[18].mxu0 %vm810_vm2, %v2732_v23 }
 0x7db   : > { %3051 = vmatprep.mubr.msk.f32.mxu0 %vm810_vm2, %v2733_v24 }
 0x7de   : > { %3052 = vmatmul.mubr.msk.f32.gmra.mrb[20].mxu0 %vm810_vm2, %v2734_v25 }
 0x7df   : > { %3054 = vmatprep.mubr.msk.f32.mxu0 %vm810_vm2, %v2735_v26  ;;  %v2763_v26 = vld [vmem:[%s4118_s6 + $0x10] sm:$0xff] }
 0x7e2   : > { %3055 = vmatmul.mubr.msk.f32.gmra.mrb[22].mxu0 %vm810_vm2, %v2736_v27 }
 0x7e3   : > { %3057 = vmatprep.mubr.msk.f32.mxu0 %vm810_vm2, %v2737_v28 }
 0x7e6   : > { %3058 = vmatmul.mubr.msk.f32.gmra.mrb[24].mxu0 %vm810_vm2, %v2738_v29 }
 0x8ad   : > { %v3050_v33 = vpop.f32.mrb[18].mxu0 }
 0x8ae   : > { %v2194_v35 = vadd.f32 %v3050_v33, %v2066_v31  ;;  %v2188_v36 = vpop.f32.mrb[19].mxu0  ;;  %v2282_v33 = vpop.permute.xlu0 %2281 }
 0x8af   : > { %v2189_v37 = vadd.f32 %v2188_v36, %v2061_v32 }
 0x8b0   : > { %v2756_v38 = vmul.f32 -1.442695, %v2194_v35 }
 0x8b1   : > { %v2755_v39 = vmul.f32 -1.442695, %v2189_v37  ;;  %v3053_v40 = vpop.f32.mrb[20].mxu0 }
 0x8b2   : > { %3382 = vpow2.f32 %v2756_v38  ;;  %v2204_v41 = vadd.f32 %v3053_v40, %v2076_v63  ;;  %v2198_v42 = vpop.f32.mrb[21].mxu0  ;;  %v2766_v63 = vld [vmem:[%s4120_s8 + $0x10] sm:$0xff] }
 0x8b3   : > { %3384 = vpow2.f32 %v2755_v39  ;;  %v2199_v44 = vadd.f32 %v2198_v42, %v2071_v34  ;;  %v2452_v39 = vmul.f32 %v3964_v11, %v3964_v11 }
 0x8b4   : > { %v2758_v46 = vmul.f32 -1.442695, %v2204_v41 }
 0x8b5   : > { %v2757_v47 = vmul.f32 -1.442695, %v2199_v44  ;;  %v3056_v48 = vpop.f32.mrb[22].mxu0  ;;  %v2453_v44 = vrot.slane %v2452_v39, 4 }
 0x8b6   : > { %3386 = vpow2.f32 %v2758_v46  ;;  %v2214_v49 = vadd.f32 %v3056_v48, %v2086_v43  ;;  %v2208_v50 = vpop.f32.mrb[23].mxu0 }
 0x8b7   : > { %3388 = vpow2.f32 %v2757_v47  ;;  %v2209_v51 = vadd.f32 %v2208_v50, %v2081_v45  ;;  %v2364_v47 = vpop.permute.xlu1 %2363  ;;  %v2454_v11 = vadd.f32 %v2453_v44, %v2452_v39 }
 0x8b8   : > { %v2760_v52 = vmul.f32 -1.442695, %v2214_v49 }
 0x8b9   : > { %v2759_v54 = vmul.f32 -1.442695, %v2209_v51  ;;  %v3059_v55 = vpop.f32.mrb[24].mxu0 }
 0x8ba   : > { %3390 = vpow2.f32 %v2760_v52  ;;  %v2224_v57 = vadd.f32 %v3059_v55, %v2096_v53  ;;  %v2218_v58 = vpop.f32.mrb[25].mxu0  ;;  %v2455_v52 = vrot.slane %v2454_v11, 2 }
 0x8bb   : > { %3392 = vpow2.f32 %v2759_v54  ;;  %v2219_v59 = vadd.f32 %v2218_v58, %v2091_v56 }
 0x8bc   : > { %v3383_v60 = vpop.eup %3382  ;;  %v2762_v61 = vmul.f32 -1.442695, %v2224_v57 }
 0x8bd   : > { %v3385_v62 = vpop.eup %3384  ;;  %v2252_v1 = vadd.f32 1.0, %v3383_v60  ;;  %v2761_v2 = vmul.f32 -1.442695, %v2219_v59 }
 0x8be   : > { %v2251_v3 = vadd.f32 1.0, %v3385_v62  ;;  %3394 = vpow2.f32 %v2762_v61 }
 0x8bf   : > { %3396 = vrcp.f32 %v2252_v1 }
 0x8c0   : > { %v3387_v4 = vpop.eup %3386  ;;  %3398 = vrcp.f32 %v2251_v3 }
 0x8c1   : > { %v3389_v5 = vpop.eup %3388  ;;  %v2254_v6 = vadd.f32 1.0, %v3387_v4  ;;  %3400 = vpow2.f32 %v2761_v2 }
 0x8c2   : > { %v2253_v21 = vadd.f32 1.0, %v3389_v5 }
 0x8c3   : > { %3402 = vrcp.f32 %v2254_v6 }
 0x8c4   : > { %v3391_v7 = vpop.eup %3390  ;;  %3404 = vrcp.f32 %v2253_v21 }
 0x8c5   : > { %v3393_v9 = vpop.eup %3392  ;;  %v2256_v10 = vadd.f32 1.0, %v3391_v7 }
 0x8c6   : > { %v2255_v12 = vadd.f32 1.0, %v3393_v9 }
 0x8c7   : > { %3406 = vrcp.f32 %v2256_v10 }
 0x8c8   : > { %v3395_v13 = vpop.eup %3394  ;;  %3408 = vrcp.f32 %v2255_v12 }
 0x8c9   : > { %v3397_v0 = vpop.eup %3396  ;;  %v2258_v16 = vadd.f32 1.0, %v3395_v13 }
 0x8ca   : > { %v3399_v17 = vpop.eup %3398 }
 0x8cb   : > { %v3401_v18 = vpop.eup %3400  ;;  %v3159_v19 = vpack.c.bf16 %v3397_v0, %v3399_v17  ;;  %3410 = vrcp.f32 %v2258_v16 }
 0x8cc   : > { %v2257_v20 = vadd.f32 1.0, %v3401_v18 }
 0x8cd   : > { %v3403_v22 = vpop.eup %3402  ;;  %3160 = vmatpush3.bf16.msra.mxu1 %v3159_v19 }
 0x8ce   : > { %v3405_v23 = vpop.eup %3404  ;;  %3412 = vrcp.f32 %v2257_v20  ;;  %3161 = vmatprep.subr.bf16.mxu1 %v3481_v14 }
 0x8cf   : > { %v3162_v24 = vpack.c.bf16 %v3403_v22, %v3405_v23 }
 0x8d1   : > { %v3407_v25 = vpop.eup %3406  ;;  %3163 = vmatpush3.bf16.msra.mxu1 %v3162_v24 }
 0x8d2   : > { %v3409_v27 = vpop.eup %3408  ;;  %3164 = vmatprep.subr.bf16.mxu1 %v3481_v14 }
 0x8d3   : > { %v3165_v28 = vpack.c.bf16 %v3407_v25, %v3409_v27 }
 0x8d4   : > { %3069 = vmatmul.mubr.msk.f32.vlgmr.msra.gmra.mrb[32].mxu1 %vm995_vm4, %v2763_v26 }
 0x8d5   : > { %3166 = vmatpush3.bf16.msra.mxu1 %v3165_v28  ;;  %3079 = vmatprep.mubr.msk.f32.mxu1 %vm3482_vm3, %v3483_v15  ;;  %v3411_v29 = vpop.eup %3410 }
 0x8d6   : > { %3167 = vmatprep.subr.bf16.mxu1 %v3481_v14 }
 0x8d8   : > { %v3413_v31 = vpop.eup %3412 }
 0x8d9   : > { %v3168_v32 = vpack.c.bf16 %v3411_v29, %v3413_v31 }
 0x8db   : > { %3169 = vmatpush3.bf16.msra.mxu1 %v3168_v32 }
 0x8de   : > { %3080 = vmatmul.mubr.msk.f32.vlgmr.msra.gmra.mrb[34].mxu1 %vm995_vm4, %v2766_v63 }
 0x9a7   : > { %v2353_v34 = vpop.f32.mrb[32].mxu1 }
 0x9a8   : > { %v2354_v35 = vadd.f32 %v2353_v34, %v2282_v33  ;;  %v3070_v36 = vpop.f32.mrb[33].mxu1 }
 0x9aa   : > { %v2439_v37 = vmul.f32 1.442695, %v2354_v35  ;;  %v2443_v15 = vrot.slane %v2354_v35, 4 }
 0x9ac   : > { %3414 = vpow2.f32 %v2439_v37  ;;  %v2444_v38 = vadd.f32 %v2443_v15, %v2354_v35 }
 0x9ae   : > { %v2445_v14 = vrot.slane %v2444_v38, 2 }
 0x9b0   : > { %v2446_v40 = vadd.f32 %v2445_v14, %v2444_v38 }
 0x9b1   : > { %v2435_v41 = vpop.f32.mrb[34].mxu1 }
 0x9b2   : > { %v2447_v42 = vrot.slane %v2446_v40, 1  ;;  %v3081_v43 = vpop.f32.mrb[35].mxu1  ;;  %v2436_v49 = vadd.f32 %v2435_v41, %v2364_v47 }
 0x9b4   : > { %v2448_v45 = vadd.f32 %v2447_v42, %v2446_v40 }
 0x9b6   : > { %v3415_v46 = vpop.eup %3414  ;;  %v2449_v48 = vadd.f32 %v2448_v45, %v3961_v8 }
 0x9b7   : > { %v2441_v50 = vmul.f32 %v3415_v46, %v3875_v30 }
 0x9b9   : > { %v2442_v51 = vadd.f32 %v2441_v50, %v2436_v49 }
 0x9bb   : > { %2451 = vst [vmem:[%s3970_s29 + $0x8] sm:$0xff] %v2442_v51  ;;  %v2459_v53 = vmul.f32 %v2442_v51, %v2442_v51 }
 0x9bc   : > { %3429 = shalt.err (!%p3426_p5)
}
 0x9bd   : > { %s3430_s29 = scalar_lea.hbm %s4060_s15, 256  ;;  %s3434_s22 = scalar_lea.hbm %s4122_s10, 512 }
 0x9be   : > { %p3431_p7 = scmp.ne.s32.totalorder %s4060_s15, %s3430_s29  ;;  %p3435_p12 = scmp.lt.u32.totalorder %s4060_s15, %s4122_s10 }
 0x9bf   : > { %p3436_p13 = scmp.lt.u32.totalorder %s3434_s22, %s3430_s29  ;;  %p3438_p1 = scmp.lt.u32.totalorder %s3430_s29, %s4060_s15 }
 0x9c0   : > { %p3432_p10 = pnand %p3431_p7, %p3587_p6 }
 0x9c1   : > { %p3437_p0 = por %p3436_p13, %p3435_p12 }
 0x9c2   : > { %p3433_p11 = pneg %p3432_p10 }
 0x9c3   : > { %p3439_p2 = por %p3438_p1, %p3437_p0 }
 0x9c5   : > { %p3440_p3 = pnand %p3439_p2, %p3433_p11 }
 0x9c7   : > { %3443 = shalt.err (!%p3440_p3)
}
 0x9c8   : > { %s3485_s1 = smov 128   ;;  %s3486_s25 = smov 256   ;;  %v2460_v30 = vrot.slane %v2459_v53, 4  ;;  %v2456_v8 = vadd.f32 %v2455_v52, %v2454_v11  ;;  %vm2469_vm5 = vcmask 1040384  }
 0x9c9   : > { %s3487_s13 = smov 8   ;;  %p430_p4 = scmp.lt.s32.totalorder %s3569_s21, 1 }
 0x9ca   : > { %3170 = dma.vmem_to_hbm [thread:$0]  (%p3587_p6), %s4054_s14, 256, %s4060_s15, %s4065_s24, %s3485_s1, %s3486_s25, %s3487_s13   ;;  %v2461_v54 = vadd.f32 %v2460_v30, %v2459_v53  ;;  %v2457_v56 = vrot.slane %v2456_v8, 1 }
 0x9cb   : > { %s4137_s21 = smov (!%p430_p4, %s3569_s21), 1 }
 0x9cc   : > { %v2462_v55 = vrot.slane %v2461_v54, 2  ;;  %v2458_v59 = vadd.f32 %v2457_v56, %v2456_v8  ;;  %s2592_s29 = sshll.u32 %s4137_s21, 1 }
 0x9cd   : > { %s433_s27 = scalar_lea.vmem %s4123_s11, %s2592_s29 }
 0x9ce   : > { %v2463_v57 = vadd.f32 %v2462_v55, %v2461_v54 }
 0x9d0   : > { %v2464_v58 = vrot.slane %v2463_v57, 1 }
 0x9d2   : > { %v2465_v60 = vadd.f32 %v2464_v58, %v2463_v57 }
 0x9d4   : > { %v2466_v61 = vadd.f32 %v2465_v60, %v2458_v59 }
 0x9d6   : > { %v2467_v62 = vmul.f32 -0.5, %v2466_v61 }
 0x9d8   : > { %v2769_v1 = vadd.f32 -14.703016, %v2467_v62 }
 0x9da   : > { %v2470_v2 = vsel %vm2469_vm5, %v2769_v1, %v2449_v48 }
 0x9db   : > { %2471 = vst [vmem:[%s433_s27] sm:$0x3] %v2470_v2 }
 0x9dc PF: > { %s2507_s14 = sand.u32 1, %s3466_s17   ;;  %p3173_p6 = pnand %p2586_p9, %p3591_p8 }
 0x9dd   : > { %s2508_s15 = scalar_lea.sflag [#allocation4], %s2507_s14 }
 0x9de   : > { %3461 = dma.done.wait (!%p3173_p6), %s2508_s15, 256  }
 0x9df   : > { %3463 = vsyncadd (!%p3173_p6), %s2508_s15, 4294967040  ;;  %p22_p5 = scmp.ge.s32.totalorder %s3573_s23, 4   ;;  %s4132_s17 = smov %s3470_s18 }
 0x9e0   : > { %s4133_s18 = smov %s3474_s19  ;;  %s4134_s19 = smov %s3585_s26 }
 0x9e1   : > { %s4135_s20 = smov %s3573_s23  ;;  %24 = sbr.rel (!%p22_p5) target bundleno = 6 (0x6), region = 166 }
 0x9e8   :  { %2520 = vsyncpa [#allocation4], 1 }
 0x9e9   :  { %2522 = vsyncpa [#allocation4 + $0x1], 1 }

</bundles_post_ra>
